<compile_context>
chip_gen: v7x
topology: tpu7x:2x2x1
jax: 0.10.0
libtpu: 0.0.40
codegen_flags: <defaults>
</compile_context>

<pallas_src>
import jax
import jax.numpy as jnp
from jax import lax
from jax.experimental import pallas as pl
from jax.experimental.pallas import tpu as pltpu


def _gru_fused_kernel(obs_ref, act_ref, w_eo_ref, w_ea_ref, b_enc_ref,
                      w_i_ref, b_i_ref, w_h_ref, b_h_ref,
                      w_dec_ref, b_dec_ref, w_loc_ref, b_loc_ref,
                      loc_ref, ctx_ref,
                      hs_scr, gi_scr, h_scr):
    """Fully fused forward: encoder -> GRU recurrence -> decoder -> loc head.

    obs_ref : (H*B, n_state+1)  flattened cat(state, time); /horizon folded
                                into w_eo's time row at param-prep time.
    act_ref : (H*B, n_ctrl)
    w_eo    : (n_state+1, E)    encoder weights, obs block
    w_ea    : (n_ctrl, E)       encoder weights, action block
    w_i     : (E, 3*Hg)         fused input-gate weights, gate order (r, z, n)
    w_h     : (Hg, 3*Hg)        fused hidden-gate weights, gate order (r, z, n)
    w_dec   : (Hg, D)           decoder Linear (+ReLU)
    w_loc   : (D, n_state)      loc head
    loc_ref : (H*B, n_state)    output: state + loc_head(dec(hs))
    ctx_ref : (B, Hg)           output: final GRU hidden state (num_layers=1)
    hs_scr  : (H*B, Hg)         per-step hidden states (never leaves VMEM)
    gi_scr  : (H*B, 3*Hg)       precomputed input-gate preactivations
    h_scr   : (B, Hg)           recurrent hidden state
    """
    B, Hg = h_scr.shape
    H = hs_scr.shape[0] // B
    n_state = loc_ref.shape[1]

    # ---- Hoisted prologue (off the serial path): encoder MLP + input-gate
    # preactivations for all H*B rows as batched MXU matmuls.
    # context=None -> zero initial hidden state.
    z = jnp.maximum(
        jnp.dot(obs_ref[...], w_eo_ref[...], preferred_element_type=jnp.float32)
        + jnp.dot(act_ref[...], w_ea_ref[...], preferred_element_type=jnp.float32)
        + b_enc_ref[...],
        0.0)
    gi_scr[...] = (jnp.dot(z, w_i_ref[...], preferred_element_type=jnp.float32)
                   + b_i_ref[...])

    h_scr[...] = jnp.zeros_like(h_scr)
    # Hoisted loads / broadcasts: read once, reused every step (avoid per-step
    # broadcast_in_dim on the critical path).
    w_h = w_h_ref[...]
    b_h = jnp.broadcast_to(b_h_ref[...], (B, 3 * Hg))

    # ---- Serial recurrence: one fused (B,Hg)@(Hg,3Hg) MXU matmul per step
    # plus the gate elementwise math (f32 throughout).
    # TODO(synk): for larger Hg, hold w_h resident in the MXU across steps via
    # pltpu.matmul_push_rhs / matmul_acc_lhs / matmul_pop and pad each gate
    # block to 128 lanes so the gate slices are vreg-tile aligned; at Hg=32 the
    # extra weight rows cost more per-step MXU latency than the few lane
    # selects they would remove, so the plain fused dot is kept here.
    def step(t, carry):
        row = t * B
        if B % 8 == 0:
            row = pl.multiple_of(row, 8)        # sublane-aligned dynamic slice
        gi = gi_scr[pl.ds(row, B), :]           # (B, 3*Hg)
        h_prev = h_scr[...]                     # (B, Hg)
        gh = jnp.dot(h_prev, w_h, preferred_element_type=jnp.float32) + b_h

        # PyTorch nn.GRU cell, gate order (r, z, n). The r and z sigmoids are
        # merged into a single EUP push over 2*Hg lanes.
        ru = jax.nn.sigmoid(gi[:, :2 * Hg] + gh[:, :2 * Hg])
        r = ru[:, :Hg]
        u = ru[:, Hg:]
        n = jnp.tanh(gi[:, 2 * Hg:] + r * gh[:, 2 * Hg:])
        h = (1.0 - u) * n + u * h_prev

        h_scr[...] = h
        hs_scr[pl.ds(row, B), :] = h            # stays in VMEM
        return carry

    unroll = True if H <= 16 else 8
    lax.fori_loop(0, H, step, 0, unroll=unroll)

    # ---- Fused epilogue (batched, off the serial path): decoder MLP + loc
    # head + residual add on the VMEM-resident hidden states.
    hs = hs_scr[...]
    d = jnp.maximum(
        jnp.dot(hs, w_dec_ref[...], preferred_element_type=jnp.float32)
        + b_dec_ref[...],
        0.0)
    state = obs_ref[:, :n_state]
    loc_ref[...] = (state
                    + jnp.dot(d, w_loc_ref[...],
                              preferred_element_type=jnp.float32)
                    + b_loc_ref[...])
    ctx_ref[...] = h_scr[...]


_PACKED_WEIGHT_KEYS = ("w_eo", "w_ea", "b_enc", "w_i", "b_i", "w_h", "b_h",
                       "w_dec", "b_dec", "w_loc", "b_loc")


def prepare_params(raw, horizon):
    """One-time parameter packing (kept out of the per-call forward graph)."""
    n_state = raw["n_state"]
    w_enc = raw["w_enc"]
    # Fold the `time / horizon` scaling into the encoder's time row.
    row_scale = jnp.ones((w_enc.shape[0], 1), jnp.float32)
    row_scale = row_scale.at[n_state, 0].set(1.0 / float(horizon))
    w_enc = w_enc * row_scale
    return {
        "n_state": n_state,
        "w_eo": w_enc[:n_state + 1],          # state + time rows
        "w_ea": w_enc[n_state + 1:],          # action rows
        "b_enc": raw["b_enc"],
        # Gate order (r, z, n) -- matches torch.nn.GRU.
        "w_i": jnp.concatenate([raw["w_ir"], raw["w_iz"], raw["w_in"]], 1),
        "b_i": jnp.concatenate([raw["b_ir"], raw["b_iz"], raw["b_in"]], 1),
        "w_h": jnp.concatenate([raw["w_hr"], raw["w_hz"], raw["w_hn"]], 1),
        "b_h": jnp.concatenate([raw["b_hr"], raw["b_hz"], raw["b_hn"]], 1),
        "w_dec": raw["w_dec"], "b_dec": raw["b_dec"],
        "w_loc": raw["w_loc"], "b_loc": raw["b_loc"],
        "pre_scale": raw["pre_scale"],
    }


def gru_gauss_dynamics_forward(obs, action, packed):
    """Pallas forward. obs: (H, B, n_state + 1); action: (H, B, n_ctrl)."""
    n_state = int(packed["n_state"])
    H, B, _ = obs.shape
    Hg = packed["w_h"].shape[0]

    state = obs[..., :n_state]                # (H, B, n_state)
    time = obs[..., n_state:]                 # (H, B, 1)
    obs2d = obs.reshape(H * B, n_state + 1)
    act2d = action.reshape(H * B, action.shape[-1])

    # Explicit VMEM budget (no grid, everything resident): operands + outputs
    # + scratch with 2x headroom, clamped below every generation's physical
    # VMEM (v7x has 64 MiB per TensorCore; v5e's scoped default is 16 MiB).
    n_elems = (obs2d.size + act2d.size
               + sum(int(packed[k].size) for k in _PACKED_WEIGHT_KEYS)
               + H * B * n_state + B * Hg                    # outputs
               + H * B * Hg + H * B * 3 * Hg + B * Hg)       # scratch
    vmem_limit = int(min(max(2 * 4 * n_elems, 4 << 20), 48 << 20))

    loc2d, ctx = pl.pallas_call(
        _gru_fused_kernel,
        out_shape=(jax.ShapeDtypeStruct((H * B, n_state), jnp.float32),
                   jax.ShapeDtypeStruct((B, Hg), jnp.float32)),
        in_specs=[pl.BlockSpec(memory_space=pltpu.MemorySpace.VMEM)] * 13,
        out_specs=(pl.BlockSpec(memory_space=pltpu.MemorySpace.VMEM),
                   pl.BlockSpec(memory_space=pltpu.MemorySpace.VMEM)),
        scratch_shapes=[
            pltpu.VMEM((H * B, Hg), jnp.float32),      # hs (VMEM-only)
            pltpu.VMEM((H * B, 3 * Hg), jnp.float32),  # input-gate preacts
            pltpu.VMEM((B, Hg), jnp.float32),          # recurrent hidden state
        ],
        compiler_params=pltpu.CompilerParams(vmem_limit_bytes=vmem_limit),
    )(obs2d, act2d, packed["w_eo"], packed["w_ea"], packed["b_enc"],
      packed["w_i"], packed["b_i"], packed["w_h"], packed["b_h"],
      packed["w_dec"], packed["b_dec"], packed["w_loc"], packed["b_loc"])

    loc = loc2d.reshape(H, B, n_state)
    new_context = ctx[None]                   # (num_layers=1, B, Hg)

    # DiagScale with input_dependent_scale=False: state-independent diagonal.
    scale = jax.nn.softplus(packed["pre_scale"])          # (n_state,)
    scale_tril = jnp.broadcast_to(jnp.diag(scale), (H, B, n_state, n_state))

    return {"loc": loc, "scale_tril": scale_tril, "time": time,
            "state": state, "context": new_context}


def _ref_forward(obs, action, params, horizon):
    """Pure-JAX reference (lax.scan GRU) for a correctness check."""
    prec = jax.lax.Precision.HIGHEST
    n_state = params["n_state"]
    state = obs[..., :n_state]
    time = obs[..., n_state:]
    vec = jnp.concatenate([state, time / float(horizon), action], axis=-1)

    z = jnp.maximum(
        jnp.matmul(vec, params["w_enc"], precision=prec) + params["b_enc"], 0.0)
    B = vec.shape[1]
    Hg = params["w_hr"].shape[0]

    def step(h, zt):
        gi_r = jnp.matmul(zt, params["w_ir"], precision=prec) + params["b_ir"]
        gi_z = jnp.matmul(zt, params["w_iz"], precision=prec) + params["b_iz"]
        gi_n = jnp.matmul(zt, params["w_in"], precision=prec) + params["b_in"]
        gh_r = jnp.matmul(h, params["w_hr"], precision=prec) + params["b_hr"]
        gh_z = jnp.matmul(h, params["w_hz"], precision=prec) + params["b_hz"]
        gh_n = jnp.matmul(h, params["w_hn"], precision=prec) + params["b_hn"]
        r = jax.nn.sigmoid(gi_r + gh_r)
        u = jax.nn.sigmoid(gi_z + gh_z)
        n = jnp.tanh(gi_n + r * gh_n)
        h_new = (1.0 - u) * n + u * h
        return h_new, h_new

    h0 = jnp.zeros((B, Hg), jnp.float32)
    h_last, hs = lax.scan(step, h0, z)
    d = jnp.maximum(
        jnp.matmul(hs, params["w_dec"], precision=prec) + params["b_dec"], 0.0)
    loc = state + jnp.matmul(d, params["w_loc"], precision=prec) + params["b_loc"]
    return loc, h_last[None]


def _init_params(key, n_state, n_ctrl, enc_h, gru_h, dec_h):
    F = n_state + n_ctrl + 1

    def lin(k, fan_in, fan_out):
        bound = 1.0 / jnp.sqrt(float(fan_in))
        kw, kb = jax.random.split(k)
        w = jax.random.uniform(kw, (fan_in, fan_out), jnp.float32, -bound, bound)
        b = jax.random.uniform(kb, (1, fan_out), jnp.float32, -bound, bound)
        return w, b

    keys = jax.random.split(key, 12)
    w_enc, b_enc = lin(keys[0], F, enc_h)
    w_ir, b_ir = lin(keys[1], enc_h, gru_h)
    w_iz, b_iz = lin(keys[2], enc_h, gru_h)
    w_in, b_in = lin(keys[3], enc_h, gru_h)
    w_hr, b_hr = lin(keys[4], gru_h, gru_h)
    w_hz, b_hz = lin(keys[5], gru_h, gru_h)
    w_hn, b_hn = lin(keys[6], gru_h, gru_h)
    w_dec, b_dec = lin(keys[7], gru_h, dec_h)
    w_loc, b_loc = lin(keys[8], dec_h, n_state)
    pre_scale = jnp.zeros((n_state,), jnp.float32)     # softplus(0) ~= 0.693

    return {
        "n_state": n_state,
        "w_enc": w_enc, "b_enc": b_enc,
        "w_ir": w_ir, "w_iz": w_iz, "w_in": w_in,
        "w_hr": w_hr, "w_hz": w_hz, "w_hn": w_hn,
        "b_ir": b_ir, "b_iz": b_iz, "b_in": b_in,
        "b_hr": b_hr, "b_hz": b_hz, "b_hn": b_hn,
        "w_dec": w_dec, "b_dec": b_dec,
        "w_loc": w_loc, "b_loc": b_loc,
        "pre_scale": pre_scale,
    }


if __name__ == "__main__":
    # Small config: n_state=8, n_ctrl=7 (so enc input F=16), horizon=H=8, B=8,
    # mlp_hunits=(32,), gru_hunits=(32,).
    n_state, n_ctrl, horizon = 8, 7, 8
    H, B = 8, 8
    enc_h = gru_h = dec_h = 32

    key = jax.random.PRNGKey(0)
    kp, ks, ka = jax.random.split(key, 3)
    params = _init_params(kp, n_state, n_ctrl, enc_h, gru_h, dec_h)
    packed = prepare_params(params, horizon)           # one-time packing

    state0 = jax.random.normal(ks, (H, B, n_state), jnp.float32)
    time0 = jnp.broadcast_to(jnp.arange(H, dtype=jnp.float32)[:, None, None],
                             (H, B, 1))
    obs = jnp.concatenate([state0, time0], axis=-1)     # (H, B, n_state + 1)
    action = jax.random.normal(ka, (H, B, n_ctrl), jnp.float32)

    out = gru_gauss_dynamics_forward(obs, action, packed)
    jax.block_until_ready(out)

    ref_loc, ref_ctx = _ref_forward(obs, action, params, horizon)
    assert out["loc"].shape == (H, B, n_state)
    assert out["scale_tril"].shape == (H, B, n_state, n_state)
    assert out["context"].shape == (1, B, gru_h)
    assert jnp.allclose(out["loc"], ref_loc, atol=1e-4, rtol=1e-4)
    assert jnp.allclose(out["context"], ref_ctx, atol=1e-4, rtol=1e-4)

    print("KERNEL_OK")
</pallas_src>

<mosaic_0001>
module attributes {stable_mosaic.version = 11 : i64} {
  func.func @_gru_fused_kernel(%arg0: memref<64x9xf32, #tpu.memory_space<vmem>>, %arg1: memref<64x7xf32, #tpu.memory_space<vmem>>, %arg2: memref<9x32xf32, #tpu.memory_space<vmem>>, %arg3: memref<7x32xf32, #tpu.memory_space<vmem>>, %arg4: memref<1x32xf32, #tpu.memory_space<vmem>>, %arg5: memref<32x96xf32, #tpu.memory_space<vmem>>, %arg6: memref<1x96xf32, #tpu.memory_space<vmem>>, %arg7: memref<32x96xf32, #tpu.memory_space<vmem>>, %arg8: memref<1x96xf32, #tpu.memory_space<vmem>>, %arg9: memref<32x32xf32, #tpu.memory_space<vmem>>, %arg10: memref<1x32xf32, #tpu.memory_space<vmem>>, %arg11: memref<32x8xf32, #tpu.memory_space<vmem>>, %arg12: memref<1x8xf32, #tpu.memory_space<vmem>>, %arg13: memref<64x8xf32, #tpu.memory_space<vmem>>, %arg14: memref<8x32xf32, #tpu.memory_space<vmem>>, %arg15: memref<64x32xf32, #tpu.memory_space<vmem>>, %arg16: memref<64x96xf32, #tpu.memory_space<vmem>>, %arg17: memref<8x32xf32, #tpu.memory_space<vmem>>) attributes {dimension_semantics = [], scalar_prefetch = 0 : i64, scratch_operands = 3 : i64, tpu.core_type = #tpu.core_type<tc>} {
    %c0 = arith.constant 0 : index
    %c0_0 = arith.constant 0 : index
    %0 = vector.load %arg0[%c0, %c0_0] : memref<64x9xf32, #tpu.memory_space<vmem>>, vector<64x9xf32>
    %c0_1 = arith.constant 0 : index
    %c0_2 = arith.constant 0 : index
    %1 = vector.load %arg2[%c0_1, %c0_2] : memref<9x32xf32, #tpu.memory_space<vmem>>, vector<9x32xf32>
    %cst = arith.constant dense<0.000000e+00> : vector<64x32xf32>
    %2 = tpu.matmul %0, %1, %cst {dimension_numbers = #tpu.dot_dimension_numbers<[1], [0], [0], [1], [0, 0, 1, 1], [], []>} : vector<64x9xf32>, vector<9x32xf32>, vector<64x32xf32> -> vector<64x32xf32>
    %c0_3 = arith.constant 0 : index
    %c0_4 = arith.constant 0 : index
    %3 = vector.load %arg1[%c0_3, %c0_4] : memref<64x7xf32, #tpu.memory_space<vmem>>, vector<64x7xf32>
    %c0_5 = arith.constant 0 : index
    %c0_6 = arith.constant 0 : index
    %4 = vector.load %arg3[%c0_5, %c0_6] : memref<7x32xf32, #tpu.memory_space<vmem>>, vector<7x32xf32>
    %cst_7 = arith.constant dense<0.000000e+00> : vector<64x32xf32>
    %5 = tpu.matmul %3, %4, %cst_7 {dimension_numbers = #tpu.dot_dimension_numbers<[1], [0], [0], [1], [0, 0, 1, 1], [], []>} : vector<64x7xf32>, vector<7x32xf32>, vector<64x32xf32> -> vector<64x32xf32>
    %6 = arith.addf %2, %5 : vector<64x32xf32>
    %c0_8 = arith.constant 0 : index
    %c0_9 = arith.constant 0 : index
    %7 = vector.load %arg4[%c0_8, %c0_9] : memref<1x32xf32, #tpu.memory_space<vmem>>, vector<1x32xf32>
    %8 = vector.broadcast %7 : vector<1x32xf32> to vector<64x32xf32>
    %9 = arith.addf %6, %8 : vector<64x32xf32>
    %cst_10 = arith.constant 0.000000e+00 : f32
    %10 = vector.broadcast %cst_10 : f32 to vector<64x32xf32>
    %11 = arith.maximumf %9, %10 : vector<64x32xf32>
    %c0_11 = arith.constant 0 : index
    %c0_12 = arith.constant 0 : index
    %12 = vector.load %arg5[%c0_11, %c0_12] : memref<32x96xf32, #tpu.memory_space<vmem>>, vector<32x96xf32>
    %cst_13 = arith.constant dense<0.000000e+00> : vector<64x96xf32>
    %13 = tpu.matmul %11, %12, %cst_13 {dimension_numbers = #tpu.dot_dimension_numbers<[1], [0], [0], [1], [0, 0, 1, 1], [], []>} : vector<64x32xf32>, vector<32x96xf32>, vector<64x96xf32> -> vector<64x96xf32>
    %c0_14 = arith.constant 0 : index
    %c0_15 = arith.constant 0 : index
    %14 = vector.load %arg6[%c0_14, %c0_15] : memref<1x96xf32, #tpu.memory_space<vmem>>, vector<1x96xf32>
    %15 = vector.broadcast %14 : vector<1x96xf32> to vector<64x96xf32>
    %16 = arith.addf %13, %15 : vector<64x96xf32>
    %c0_16 = arith.constant 0 : index
    %c0_17 = arith.constant 0 : index
    %17 = vector.load %arg16[%c0_16, %c0_17] : memref<64x96xf32, #tpu.memory_space<vmem>>, vector<64x96xf32>
    tpu.vector_store %arg16[%c0_16, %c0_17], %16 {strides = array<i32>} : memref<64x96xf32, #tpu.memory_space<vmem>>, vector<64x96xf32>,
    %cst_18 = arith.constant 0.000000e+00 : f32
    %18 = vector.broadcast %cst_18 : f32 to vector<8x32xf32>
    %c0_19 = arith.constant 0 : index
    %c0_20 = arith.constant 0 : index
    %19 = vector.load %arg17[%c0_19, %c0_20] : memref<8x32xf32, #tpu.memory_space<vmem>>, vector<8x32xf32>
    tpu.vector_store %arg17[%c0_19, %c0_20], %18 {strides = array<i32>} : memref<8x32xf32, #tpu.memory_space<vmem>>, vector<8x32xf32>,
    %c0_21 = arith.constant 0 : index
    %c0_22 = arith.constant 0 : index
    %20 = vector.load %arg7[%c0_21, %c0_22] : memref<32x96xf32, #tpu.memory_space<vmem>>, vector<32x96xf32>
    %c0_23 = arith.constant 0 : index
    %c0_24 = arith.constant 0 : index
    %21 = vector.load %arg8[%c0_23, %c0_24] : memref<1x96xf32, #tpu.memory_space<vmem>>, vector<1x96xf32>
    %22 = vector.shape_cast %21 : vector<1x96xf32> to vector<1x96xf32>
    %23 = vector.broadcast %22 : vector<1x96xf32> to vector<8x96xf32>
    %c0_i32 = arith.constant 0 : i32
    %c8_i32 = arith.constant 8 : i32
    %24 = arith.muli %c0_i32, %c8_i32 : i32
    %25 = tpu.assume_multiple %24, 8 : i32
    %26 = arith.index_cast %25 : i32 to index
    %c0_25 = arith.constant 0 : index
    %27 = vector.load %arg16[%26, %c0_25] : memref<64x96xf32, #tpu.memory_space<vmem>>, vector<8x96xf32>
    %c0_26 = arith.constant 0 : index
    %c0_27 = arith.constant 0 : index
    %28 = vector.load %arg17[%c0_26, %c0_27] : memref<8x32xf32, #tpu.memory_space<vmem>>, vector<8x32xf32>
    %cst_28 = arith.constant dense<0.000000e+00> : vector<8x96xf32>
    %29 = tpu.matmul %28, %20, %cst_28 {dimension_numbers = #tpu.dot_dimension_numbers<[1], [0], [0], [1], [0, 0, 1, 1], [], []>} : vector<8x32xf32>, vector<32x96xf32>, vector<8x96xf32> -> vector<8x96xf32>
    %30 = arith.addf %29, %23 : vector<8x96xf32>
    %31 = vector.extract_strided_slice %27 {offsets = [0, 0], sizes = [8, 64], strides = [1, 1]} : vector<8x96xf32> to vector<8x64xf32>
    %32 = vector.extract_strided_slice %30 {offsets = [0, 0], sizes = [8, 64], strides = [1, 1]} : vector<8x96xf32> to vector<8x64xf32>
    %33 = arith.addf %31, %32 : vector<8x64xf32>
    %34 = arith.negf %33 : vector<8x64xf32>
    %35 = math.exp %34 : vector<8x64xf32>
    %cst_29 = arith.constant 1.000000e+00 : f32
    %36 = vector.broadcast %cst_29 : f32 to vector<8x64xf32>
    %37 = arith.addf %36, %35 : vector<8x64xf32>
    %38 = arith.divf %36, %37 : vector<8x64xf32>
    %39 = vector.extract_strided_slice %38 {offsets = [0, 0], sizes = [8, 32], strides = [1, 1]} : vector<8x64xf32> to vector<8x32xf32>
    %40 = vector.extract_strided_slice %38 {offsets = [0, 32], sizes = [8, 32], strides = [1, 1]} : vector<8x64xf32> to vector<8x32xf32>
    %41 = vector.extract_strided_slice %27 {offsets = [0, 64], sizes = [8, 32], strides = [1, 1]} : vector<8x96xf32> to vector<8x32xf32>
    %42 = vector.extract_strided_slice %30 {offsets = [0, 64], sizes = [8, 32], strides = [1, 1]} : vector<8x96xf32> to vector<8x32xf32>
    %43 = arith.mulf %39, %42 : vector<8x32xf32>
    %44 = arith.addf %41, %43 : vector<8x32xf32>
    %45 = math.tanh %44 : vector<8x32xf32>
    %cst_30 = arith.constant 1.000000e+00 : f32
    %46 = vector.broadcast %cst_30 : f32 to vector<8x32xf32>
    %47 = arith.subf %46, %40 : vector<8x32xf32>
    %48 = arith.mulf %47, %45 : vector<8x32xf32>
    %49 = arith.mulf %40, %28 : vector<8x32xf32>
    %50 = arith.addf %48, %49 : vector<8x32xf32>
    %c0_31 = arith.constant 0 : index
    %c0_32 = arith.constant 0 : index
    %51 = vector.load %arg17[%c0_31, %c0_32] : memref<8x32xf32, #tpu.memory_space<vmem>>, vector<8x32xf32>
    tpu.vector_store %arg17[%c0_31, %c0_32], %50 {strides = array<i32>} : memref<8x32xf32, #tpu.memory_space<vmem>>, vector<8x32xf32>,
    %52 = arith.index_cast %25 : i32 to index
    %c0_33 = arith.constant 0 : index
    %53 = vector.load %arg15[%52, %c0_33] : memref<64x32xf32, #tpu.memory_space<vmem>>, vector<8x32xf32>
    tpu.vector_store %arg15[%52, %c0_33], %50 {strides = array<i32>} : memref<64x32xf32, #tpu.memory_space<vmem>>, vector<8x32xf32>,
    %c1_i32 = arith.constant 1 : i32
    %c8_i32_34 = arith.constant 8 : i32
    %54 = arith.muli %c1_i32, %c8_i32_34 : i32
    %55 = tpu.assume_multiple %54, 8 : i32
    %56 = arith.index_cast %55 : i32 to index
    %c0_35 = arith.constant 0 : index
    %57 = vector.load %arg16[%56, %c0_35] : memref<64x96xf32, #tpu.memory_space<vmem>>, vector<8x96xf32>
    %c0_36 = arith.constant 0 : index
    %c0_37 = arith.constant 0 : index
    %58 = vector.load %arg17[%c0_36, %c0_37] : memref<8x32xf32, #tpu.memory_space<vmem>>, vector<8x32xf32>
    %cst_38 = arith.constant dense<0.000000e+00> : vector<8x96xf32>
    %59 = tpu.matmul %58, %20, %cst_38 {dimension_numbers = #tpu.dot_dimension_numbers<[1], [0], [0], [1], [0, 0, 1, 1], [], []>} : vector<8x32xf32>, vector<32x96xf32>, vector<8x96xf32> -> vector<8x96xf32>
    %60 = arith.addf %59, %23 : vector<8x96xf32>
    %61 = vector.extract_strided_slice %57 {offsets = [0, 0], sizes = [8, 64], strides = [1, 1]} : vector<8x96xf32> to vector<8x64xf32>
    %62 = vector.extract_strided_slice %60 {offsets = [0, 0], sizes = [8, 64], strides = [1, 1]} : vector<8x96xf32> to vector<8x64xf32>
    %63 = arith.addf %61, %62 : vector<8x64xf32>
    %64 = arith.negf %63 : vector<8x64xf32>
    %65 = math.exp %64 : vector<8x64xf32>
    %cst_39 = arith.constant 1.000000e+00 : f32
    %66 = vector.broadcast %cst_39 : f32 to vector<8x64xf32>
    %67 = arith.addf %66, %65 : vector<8x64xf32>
    %68 = arith.divf %66, %67 : vector<8x64xf32>
    %69 = vector.extract_strided_slice %68 {offsets = [0, 0], sizes = [8, 32], strides = [1, 1]} : vector<8x64xf32> to vector<8x32xf32>
    %70 = vector.extract_strided_slice %68 {offsets = [0, 32], sizes = [8, 32], strides = [1, 1]} : vector<8x64xf32> to vector<8x32xf32>
    %71 = vector.extract_strided_slice %57 {offsets = [0, 64], sizes = [8, 32], strides = [1, 1]} : vector<8x96xf32> to vector<8x32xf32>
    %72 = vector.extract_strided_slice %60 {offsets = [0, 64], sizes = [8, 32], strides = [1, 1]} : vector<8x96xf32> to vector<8x32xf32>
    %73 = arith.mulf %69, %72 : vector<8x32xf32>
    %74 = arith.addf %71, %73 : vector<8x32xf32>
    %75 = math.tanh %74 : vector<8x32xf32>
    %cst_40 = arith.constant 1.000000e+00 : f32
    %76 = vector.broadcast %cst_40 : f32 to vector<8x32xf32>
    %77 = arith.subf %76, %70 : vector<8x32xf32>
    %78 = arith.mulf %77, %75 : vector<8x32xf32>
    %79 = arith.mulf %70, %58 : vector<8x32xf32>
    %80 = arith.addf %78, %79 : vector<8x32xf32>
    %c0_41 = arith.constant 0 : index
    %c0_42 = arith.constant 0 : index
    %81 = vector.load %arg17[%c0_41, %c0_42] : memref<8x32xf32, #tpu.memory_space<vmem>>, vector<8x32xf32>
    tpu.vector_store %arg17[%c0_41, %c0_42], %80 {strides = array<i32>} : memref<8x32xf32, #tpu.memory_space<vmem>>, vector<8x32xf32>,
    %82 = arith.index_cast %55 : i32 to index
    %c0_43 = arith.constant 0 : index
    %83 = vector.load %arg15[%82, %c0_43] : memref<64x32xf32, #tpu.memory_space<vmem>>, vector<8x32xf32>
    tpu.vector_store %arg15[%82, %c0_43], %80 {strides = array<i32>} : memref<64x32xf32, #tpu.memory_space<vmem>>, vector<8x32xf32>,
    %c2_i32 = arith.constant 2 : i32
    %c8_i32_44 = arith.constant 8 : i32
    %84 = arith.muli %c2_i32, %c8_i32_44 : i32
    %85 = tpu.assume_multiple %84, 8 : i32
    %86 = arith.index_cast %85 : i32 to index
    %c0_45 = arith.constant 0 : index
    %87 = vector.load %arg16[%86, %c0_45] : memref<64x96xf32, #tpu.memory_space<vmem>>, vector<8x96xf32>
    %c0_46 = arith.constant 0 : index
    %c0_47 = arith.constant 0 : index
    %88 = vector.load %arg17[%c0_46, %c0_47] : memref<8x32xf32, #tpu.memory_space<vmem>>, vector<8x32xf32>
    %cst_48 = arith.constant dense<0.000000e+00> : vector<8x96xf32>
    %89 = tpu.matmul %88, %20, %cst_48 {dimension_numbers = #tpu.dot_dimension_numbers<[1], [0], [0], [1], [0, 0, 1, 1], [], []>} : vector<8x32xf32>, vector<32x96xf32>, vector<8x96xf32> -> vector<8x96xf32>
    %90 = arith.addf %89, %23 : vector<8x96xf32>
    %91 = vector.extract_strided_slice %87 {offsets = [0, 0], sizes = [8, 64], strides = [1, 1]} : vector<8x96xf32> to vector<8x64xf32>
    %92 = vector.extract_strided_slice %90 {offsets = [0, 0], sizes = [8, 64], strides = [1, 1]} : vector<8x96xf32> to vector<8x64xf32>
    %93 = arith.addf %91, %92 : vector<8x64xf32>
    %94 = arith.negf %93 : vector<8x64xf32>
    %95 = math.exp %94 : vector<8x64xf32>
    %cst_49 = arith.constant 1.000000e+00 : f32
    %96 = vector.broadcast %cst_49 : f32 to vector<8x64xf32>
    %97 = arith.addf %96, %95 : vector<8x64xf32>
    %98 = arith.divf %96, %97 : vector<8x64xf32>
    %99 = vector.extract_strided_slice %98 {offsets = [0, 0], sizes = [8, 32], strides = [1, 1]} : vector<8x64xf32> to vector<8x32xf32>
    %100 = vector.extract_strided_slice %98 {offsets = [0, 32], sizes = [8, 32], strides = [1, 1]} : vector<8x64xf32> to vector<8x32xf32>
    %101 = vector.extract_strided_slice %87 {offsets = [0, 64], sizes = [8, 32], strides = [1, 1]} : vector<8x96xf32> to vector<8x32xf32>
    %102 = vector.extract_strided_slice %90 {offsets = [0, 64], sizes = [8, 32], strides = [1, 1]} : vector<8x96xf32> to vector<8x32xf32>
    %103 = arith.mulf %99, %102 : vector<8x32xf32>
    %104 = arith.addf %101, %103 : vector<8x32xf32>
    %105 = math.tanh %104 : vector<8x32xf32>
    %cst_50 = arith.constant 1.000000e+00 : f32
    %106 = vector.broadcast %cst_50 : f32 to vector<8x32xf32>
    %107 = arith.subf %106, %100 : vector<8x32xf32>
    %108 = arith.mulf %107, %105 : vector<8x32xf32>
    %109 = arith.mulf %100, %88 : vector<8x32xf32>
    %110 = arith.addf %108, %109 : vector<8x32xf32>
    %c0_51 = arith.constant 0 : index
    %c0_52 = arith.constant 0 : index
    %111 = vector.load %arg17[%c0_51, %c0_52] : memref<8x32xf32, #tpu.memory_space<vmem>>, vector<8x32xf32>
    tpu.vector_store %arg17[%c0_51, %c0_52], %110 {strides = array<i32>} : memref<8x32xf32, #tpu.memory_space<vmem>>, vector<8x32xf32>,
    %112 = arith.index_cast %85 : i32 to index
    %c0_53 = arith.constant 0 : index
    %113 = vector.load %arg15[%112, %c0_53] : memref<64x32xf32, #tpu.memory_space<vmem>>, vector<8x32xf32>
    tpu.vector_store %arg15[%112, %c0_53], %110 {strides = array<i32>} : memref<64x32xf32, #tpu.memory_space<vmem>>, vector<8x32xf32>,
    %c3_i32 = arith.constant 3 : i32
    %c8_i32_54 = arith.constant 8 : i32
    %114 = arith.muli %c3_i32, %c8_i32_54 : i32
    %115 = tpu.assume_multiple %114, 8 : i32
    %116 = arith.index_cast %115 : i32 to index
    %c0_55 = arith.constant 0 : index
    %117 = vector.load %arg16[%116, %c0_55] : memref<64x96xf32, #tpu.memory_space<vmem>>, vector<8x96xf32>
    %c0_56 = arith.constant 0 : index
    %c0_57 = arith.constant 0 : index
    %118 = vector.load %arg17[%c0_56, %c0_57] : memref<8x32xf32, #tpu.memory_space<vmem>>, vector<8x32xf32>
    %cst_58 = arith.constant dense<0.000000e+00> : vector<8x96xf32>
    %119 = tpu.matmul %118, %20, %cst_58 {dimension_numbers = #tpu.dot_dimension_numbers<[1], [0], [0], [1], [0, 0, 1, 1], [], []>} : vector<8x32xf32>, vector<32x96xf32>, vector<8x96xf32> -> vector<8x96xf32>
    %120 = arith.addf %119, %23 : vector<8x96xf32>
    %121 = vector.extract_strided_slice %117 {offsets = [0, 0], sizes = [8, 64], strides = [1, 1]} : vector<8x96xf32> to vector<8x64xf32>
    %122 = vector.extract_strided_slice %120 {offsets = [0, 0], sizes = [8, 64], strides = [1, 1]} : vector<8x96xf32> to vector<8x64xf32>
    %123 = arith.addf %121, %122 : vector<8x64xf32>
    %124 = arith.negf %123 : vector<8x64xf32>
    %125 = math.exp %124 : vector<8x64xf32>
    %cst_59 = arith.constant 1.000000e+00 : f32
    %126 = vector.broadcast %cst_59 : f32 to vector<8x64xf32>
    %127 = arith.addf %126, %125 : vector<8x64xf32>
    %128 = arith.divf %126, %127 : vector<8x64xf32>
    %129 = vector.extract_strided_slice %128 {offsets = [0, 0], sizes = [8, 32], strides = [1, 1]} : vector<8x64xf32> to vector<8x32xf32>
    %130 = vector.extract_strided_slice %128 {offsets = [0, 32], sizes = [8, 32], strides = [1, 1]} : vector<8x64xf32> to vector<8x32xf32>
    %131 = vector.extract_strided_slice %117 {offsets = [0, 64], sizes = [8, 32], strides = [1, 1]} : vector<8x96xf32> to vector<8x32xf32>
    %132 = vector.extract_strided_slice %120 {offsets = [0, 64], sizes = [8, 32], strides = [1, 1]} : vector<8x96xf32> to vector<8x32xf32>
    %133 = arith.mulf %129, %132 : vector<8x32xf32>
    %134 = arith.addf %131, %133 : vector<8x32xf32>
    %135 = math.tanh %134 : vector<8x32xf32>
    %cst_60 = arith.constant 1.000000e+00 : f32
    %136 = vector.broadcast %cst_60 : f32 to vector<8x32xf32>
    %137 = arith.subf %136, %130 : vector<8x32xf32>
    %138 = arith.mulf %137, %135 : vector<8x32xf32>
    %139 = arith.mulf %130, %118 : vector<8x32xf32>
    %140 = arith.addf %138, %139 : vector<8x32xf32>
    %c0_61 = arith.constant 0 : index
    %c0_62 = arith.constant 0 : index
    %141 = vector.load %arg17[%c0_61, %c0_62] : memref<8x32xf32, #tpu.memory_space<vmem>>, vector<8x32xf32>
    tpu.vector_store %arg17[%c0_61, %c0_62], %140 {strides = array<i32>} : memref<8x32xf32, #tpu.memory_space<vmem>>, vector<8x32xf32>,
    %142 = arith.index_cast %115 : i32 to index
    %c0_63 = arith.constant 0 : index
    %143 = vector.load %arg15[%142, %c0_63] : memref<64x32xf32, #tpu.memory_space<vmem>>, vector<8x32xf32>
    tpu.vector_store %arg15[%142, %c0_63], %140 {strides = array<i32>} : memref<64x32xf32, #tpu.memory_space<vmem>>, vector<8x32xf32>,
    %c4_i32 = arith.constant 4 : i32
    %c8_i32_64 = arith.constant 8 : i32
    %144 = arith.muli %c4_i32, %c8_i32_64 : i32
    %145 = tpu.assume_multiple %144, 8 : i32
    %146 = arith.index_cast %145 : i32 to index
    %c0_65 = arith.constant 0 : index
    %147 = vector.load %arg16[%146, %c0_65] : memref<64x96xf32, #tpu.memory_space<vmem>>, vector<8x96xf32>
    %c0_66 = arith.constant 0 : index
    %c0_67 = arith.constant 0 : index
    %148 = vector.load %arg17[%c0_66, %c0_67] : memref<8x32xf32, #tpu.memory_space<vmem>>, vector<8x32xf32>
    %cst_68 = arith.constant dense<0.000000e+00> : vector<8x96xf32>
    %149 = tpu.matmul %148, %20, %cst_68 {dimension_numbers = #tpu.dot_dimension_numbers<[1], [0], [0], [1], [0, 0, 1, 1], [], []>} : vector<8x32xf32>, vector<32x96xf32>, vector<8x96xf32> -> vector<8x96xf32>
    %150 = arith.addf %149, %23 : vector<8x96xf32>
    %151 = vector.extract_strided_slice %147 {offsets = [0, 0], sizes = [8, 64], strides = [1, 1]} : vector<8x96xf32> to vector<8x64xf32>
    %152 = vector.extract_strided_slice %150 {offsets = [0, 0], sizes = [8, 64], strides = [1, 1]} : vector<8x96xf32> to vector<8x64xf32>
    %153 = arith.addf %151, %152 : vector<8x64xf32>
    %154 = arith.negf %153 : vector<8x64xf32>
    %155 = math.exp %154 : vector<8x64xf32>
    %cst_69 = arith.constant 1.000000e+00 : f32
    %156 = vector.broadcast %cst_69 : f32 to vector<8x64xf32>
    %157 = arith.addf %156, %155 : vector<8x64xf32>
    %158 = arith.divf %156, %157 : vector<8x64xf32>
    %159 = vector.extract_strided_slice %158 {offsets = [0, 0], sizes = [8, 32], strides = [1, 1]} : vector<8x64xf32> to vector<8x32xf32>
    %160 = vector.extract_strided_slice %158 {offsets = [0, 32], sizes = [8, 32], strides = [1, 1]} : vector<8x64xf32> to vector<8x32xf32>
    %161 = vector.extract_strided_slice %147 {offsets = [0, 64], sizes = [8, 32], strides = [1, 1]} : vector<8x96xf32> to vector<8x32xf32>
    %162 = vector.extract_strided_slice %150 {offsets = [0, 64], sizes = [8, 32], strides = [1, 1]} : vector<8x96xf32> to vector<8x32xf32>
    %163 = arith.mulf %159, %162 : vector<8x32xf32>
    %164 = arith.addf %161, %163 : vector<8x32xf32>
    %165 = math.tanh %164 : vector<8x32xf32>
    %cst_70 = arith.constant 1.000000e+00 : f32
    %166 = vector.broadcast %cst_70 : f32 to vector<8x32xf32>
    %167 = arith.subf %166, %160 : vector<8x32xf32>
    %168 = arith.mulf %167, %165 : vector<8x32xf32>
    %169 = arith.mulf %160, %148 : vector<8x32xf32>
    %170 = arith.addf %168, %169 : vector<8x32xf32>
    %c0_71 = arith.constant 0 : index
    %c0_72 = arith.constant 0 : index
    %171 = vector.load %arg17[%c0_71, %c0_72] : memref<8x32xf32, #tpu.memory_space<vmem>>, vector<8x32xf32>
    tpu.vector_store %arg17[%c0_71, %c0_72], %170 {strides = array<i32>} : memref<8x32xf32, #tpu.memory_space<vmem>>, vector<8x32xf32>,
    %172 = arith.index_cast %145 : i32 to index
    %c0_73 = arith.constant 0 : index
    %173 = vector.load %arg15[%172, %c0_73] : memref<64x32xf32, #tpu.memory_space<vmem>>, vector<8x32xf32>
    tpu.vector_store %arg15[%172, %c0_73], %170 {strides = array<i32>} : memref<64x32xf32, #tpu.memory_space<vmem>>, vector<8x32xf32>,
    %c5_i32 = arith.constant 5 : i32
    %c8_i32_74 = arith.constant 8 : i32
    %174 = arith.muli %c5_i32, %c8_i32_74 : i32
    %175 = tpu.assume_multiple %174, 8 : i32
    %176 = arith.index_cast %175 : i32 to index
    %c0_75 = arith.constant 0 : index
    %177 = vector.load %arg16[%176, %c0_75] : memref<64x96xf32, #tpu.memory_space<vmem>>, vector<8x96xf32>
    %c0_76 = arith.constant 0 : index
    %c0_77 = arith.constant 0 : index
    %178 = vector.load %arg17[%c0_76, %c0_77] : memref<8x32xf32, #tpu.memory_space<vmem>>, vector<8x32xf32>
    %cst_78 = arith.constant dense<0.000000e+00> : vector<8x96xf32>
    %179 = tpu.matmul %178, %20, %cst_78 {dimension_numbers = #tpu.dot_dimension_numbers<[1], [0], [0], [1], [0, 0, 1, 1], [], []>} : vector<8x32xf32>, vector<32x96xf32>, vector<8x96xf32> -> vector<8x96xf32>
    %180 = arith.addf %179, %23 : vector<8x96xf32>
    %181 = vector.extract_strided_slice %177 {offsets = [0, 0], sizes = [8, 64], strides = [1, 1]} : vector<8x96xf32> to vector<8x64xf32>
    %182 = vector.extract_strided_slice %180 {offsets = [0, 0], sizes = [8, 64], strides = [1, 1]} : vector<8x96xf32> to vector<8x64xf32>
    %183 = arith.addf %181, %182 : vector<8x64xf32>
    %184 = arith.negf %183 : vector<8x64xf32>
    %185 = math.exp %184 : vector<8x64xf32>
    %cst_79 = arith.constant 1.000000e+00 : f32
    %186 = vector.broadcast %cst_79 : f32 to vector<8x64xf32>
    %187 = arith.addf %186, %185 : vector<8x64xf32>
    %188 = arith.divf %186, %187 : vector<8x64xf32>
    %189 = vector.extract_strided_slice %188 {offsets = [0, 0], sizes = [8, 32], strides = [1, 1]} : vector<8x64xf32> to vector<8x32xf32>
    %190 = vector.extract_strided_slice %188 {offsets = [0, 32], sizes = [8, 32], strides = [1, 1]} : vector<8x64xf32> to vector<8x32xf32>
    %191 = vector.extract_strided_slice %177 {offsets = [0, 64], sizes = [8, 32], strides = [1, 1]} : vector<8x96xf32> to vector<8x32xf32>
    %192 = vector.extract_strided_slice %180 {offsets = [0, 64], sizes = [8, 32], strides = [1, 1]} : vector<8x96xf32> to vector<8x32xf32>
    %193 = arith.mulf %189, %192 : vector<8x32xf32>
    %194 = arith.addf %191, %193 : vector<8x32xf32>
    %195 = math.tanh %194 : vector<8x32xf32>
    %cst_80 = arith.constant 1.000000e+00 : f32
    %196 = vector.broadcast %cst_80 : f32 to vector<8x32xf32>
    %197 = arith.subf %196, %190 : vector<8x32xf32>
    %198 = arith.mulf %197, %195 : vector<8x32xf32>
    %199 = arith.mulf %190, %178 : vector<8x32xf32>
    %200 = arith.addf %198, %199 : vector<8x32xf32>
    %c0_81 = arith.constant 0 : index
    %c0_82 = arith.constant 0 : index
    %201 = vector.load %arg17[%c0_81, %c0_82] : memref<8x32xf32, #tpu.memory_space<vmem>>, vector<8x32xf32>
    tpu.vector_store %arg17[%c0_81, %c0_82], %200 {strides = array<i32>} : memref<8x32xf32, #tpu.memory_space<vmem>>, vector<8x32xf32>,
    %202 = arith.index_cast %175 : i32 to index
    %c0_83 = arith.constant 0 : index
    %203 = vector.load %arg15[%202, %c0_83] : memref<64x32xf32, #tpu.memory_space<vmem>>, vector<8x32xf32>
    tpu.vector_store %arg15[%202, %c0_83], %200 {strides = array<i32>} : memref<64x32xf32, #tpu.memory_space<vmem>>, vector<8x32xf32>,
    %c6_i32 = arith.constant 6 : i32
    %c8_i32_84 = arith.constant 8 : i32
    %204 = arith.muli %c6_i32, %c8_i32_84 : i32
    %205 = tpu.assume_multiple %204, 8 : i32
    %206 = arith.index_cast %205 : i32 to index
    %c0_85 = arith.constant 0 : index
    %207 = vector.load %arg16[%206, %c0_85] : memref<64x96xf32, #tpu.memory_space<vmem>>, vector<8x96xf32>
    %c0_86 = arith.constant 0 : index
    %c0_87 = arith.constant 0 : index
    %208 = vector.load %arg17[%c0_86, %c0_87] : memref<8x32xf32, #tpu.memory_space<vmem>>, vector<8x32xf32>
    %cst_88 = arith.constant dense<0.000000e+00> : vector<8x96xf32>
    %209 = tpu.matmul %208, %20, %cst_88 {dimension_numbers = #tpu.dot_dimension_numbers<[1], [0], [0], [1], [0, 0, 1, 1], [], []>} : vector<8x32xf32>, vector<32x96xf32>, vector<8x96xf32> -> vector<8x96xf32>
    %210 = arith.addf %209, %23 : vector<8x96xf32>
    %211 = vector.extract_strided_slice %207 {offsets = [0, 0], sizes = [8, 64], strides = [1, 1]} : vector<8x96xf32> to vector<8x64xf32>
    %212 = vector.extract_strided_slice %210 {offsets = [0, 0], sizes = [8, 64], strides = [1, 1]} : vector<8x96xf32> to vector<8x64xf32>
    %213 = arith.addf %211, %212 : vector<8x64xf32>
    %214 = arith.negf %213 : vector<8x64xf32>
    %215 = math.exp %214 : vector<8x64xf32>
    %cst_89 = arith.constant 1.000000e+00 : f32
    %216 = vector.broadcast %cst_89 : f32 to vector<8x64xf32>
    %217 = arith.addf %216, %215 : vector<8x64xf32>
    %218 = arith.divf %216, %217 : vector<8x64xf32>
    %219 = vector.extract_strided_slice %218 {offsets = [0, 0], sizes = [8, 32], strides = [1, 1]} : vector<8x64xf32> to vector<8x32xf32>
    %220 = vector.extract_strided_slice %218 {offsets = [0, 32], sizes = [8, 32], strides = [1, 1]} : vector<8x64xf32> to vector<8x32xf32>
    %221 = vector.extract_strided_slice %207 {offsets = [0, 64], sizes = [8, 32], strides = [1, 1]} : vector<8x96xf32> to vector<8x32xf32>
    %222 = vector.extract_strided_slice %210 {offsets = [0, 64], sizes = [8, 32], strides = [1, 1]} : vector<8x96xf32> to vector<8x32xf32>
    %223 = arith.mulf %219, %222 : vector<8x32xf32>
    %224 = arith.addf %221, %223 : vector<8x32xf32>
    %225 = math.tanh %224 : vector<8x32xf32>
    %cst_90 = arith.constant 1.000000e+00 : f32
    %226 = vector.broadcast %cst_90 : f32 to vector<8x32xf32>
    %227 = arith.subf %226, %220 : vector<8x32xf32>
    %228 = arith.mulf %227, %225 : vector<8x32xf32>
    %229 = arith.mulf %220, %208 : vector<8x32xf32>
    %230 = arith.addf %228, %229 : vector<8x32xf32>
    %c0_91 = arith.constant 0 : index
    %c0_92 = arith.constant 0 : index
    %231 = vector.load %arg17[%c0_91, %c0_92] : memref<8x32xf32, #tpu.memory_space<vmem>>, vector<8x32xf32>
    tpu.vector_store %arg17[%c0_91, %c0_92], %230 {strides = array<i32>} : memref<8x32xf32, #tpu.memory_space<vmem>>, vector<8x32xf32>,
    %232 = arith.index_cast %205 : i32 to index
    %c0_93 = arith.constant 0 : index
    %233 = vector.load %arg15[%232, %c0_93] : memref<64x32xf32, #tpu.memory_space<vmem>>, vector<8x32xf32>
    tpu.vector_store %arg15[%232, %c0_93], %230 {strides = array<i32>} : memref<64x32xf32, #tpu.memory_space<vmem>>, vector<8x32xf32>,
    %c7_i32 = arith.constant 7 : i32
    %c8_i32_94 = arith.constant 8 : i32
    %234 = arith.muli %c7_i32, %c8_i32_94 : i32
    %235 = tpu.assume_multiple %234, 8 : i32
    %236 = arith.index_cast %235 : i32 to index
    %c0_95 = arith.constant 0 : index
    %237 = vector.load %arg16[%236, %c0_95] : memref<64x96xf32, #tpu.memory_space<vmem>>, vector<8x96xf32>
    %c0_96 = arith.constant 0 : index
    %c0_97 = arith.constant 0 : index
    %238 = vector.load %arg17[%c0_96, %c0_97] : memref<8x32xf32, #tpu.memory_space<vmem>>, vector<8x32xf32>
    %cst_98 = arith.constant dense<0.000000e+00> : vector<8x96xf32>
    %239 = tpu.matmul %238, %20, %cst_98 {dimension_numbers = #tpu.dot_dimension_numbers<[1], [0], [0], [1], [0, 0, 1, 1], [], []>} : vector<8x32xf32>, vector<32x96xf32>, vector<8x96xf32> -> vector<8x96xf32>
    %240 = arith.addf %239, %23 : vector<8x96xf32>
    %241 = vector.extract_strided_slice %237 {offsets = [0, 0], sizes = [8, 64], strides = [1, 1]} : vector<8x96xf32> to vector<8x64xf32>
    %242 = vector.extract_strided_slice %240 {offsets = [0, 0], sizes = [8, 64], strides = [1, 1]} : vector<8x96xf32> to vector<8x64xf32>
    %243 = arith.addf %241, %242 : vector<8x64xf32>
    %244 = arith.negf %243 : vector<8x64xf32>
    %245 = math.exp %244 : vector<8x64xf32>
    %cst_99 = arith.constant 1.000000e+00 : f32
    %246 = vector.broadcast %cst_99 : f32 to vector<8x64xf32>
    %247 = arith.addf %246, %245 : vector<8x64xf32>
    %248 = arith.divf %246, %247 : vector<8x64xf32>
    %249 = vector.extract_strided_slice %248 {offsets = [0, 0], sizes = [8, 32], strides = [1, 1]} : vector<8x64xf32> to vector<8x32xf32>
    %250 = vector.extract_strided_slice %248 {offsets = [0, 32], sizes = [8, 32], strides = [1, 1]} : vector<8x64xf32> to vector<8x32xf32>
    %251 = vector.extract_strided_slice %237 {offsets = [0, 64], sizes = [8, 32], strides = [1, 1]} : vector<8x96xf32> to vector<8x32xf32>
    %252 = vector.extract_strided_slice %240 {offsets = [0, 64], sizes = [8, 32], strides = [1, 1]} : vector<8x96xf32> to vector<8x32xf32>
    %253 = arith.mulf %249, %252 : vector<8x32xf32>
    %254 = arith.addf %251, %253 : vector<8x32xf32>
    %255 = math.tanh %254 : vector<8x32xf32>
    %cst_100 = arith.constant 1.000000e+00 : f32
    %256 = vector.broadcast %cst_100 : f32 to vector<8x32xf32>
    %257 = arith.subf %256, %250 : vector<8x32xf32>
    %258 = arith.mulf %257, %255 : vector<8x32xf32>
    %259 = arith.mulf %250, %238 : vector<8x32xf32>
    %260 = arith.addf %258, %259 : vector<8x32xf32>
    %c0_101 = arith.constant 0 : index
    %c0_102 = arith.constant 0 : index
    %261 = vector.load %arg17[%c0_101, %c0_102] : memref<8x32xf32, #tpu.memory_space<vmem>>, vector<8x32xf32>
    tpu.vector_store %arg17[%c0_101, %c0_102], %260 {strides = array<i32>} : memref<8x32xf32, #tpu.memory_space<vmem>>, vector<8x32xf32>,
    %262 = arith.index_cast %235 : i32 to index
    %c0_103 = arith.constant 0 : index
    %263 = vector.load %arg15[%262, %c0_103] : memref<64x32xf32, #tpu.memory_space<vmem>>, vector<8x32xf32>
    tpu.vector_store %arg15[%262, %c0_103], %260 {strides = array<i32>} : memref<64x32xf32, #tpu.memory_space<vmem>>, vector<8x32xf32>,
    %c8_i32_104 = arith.constant 8 : i32
    %c0_105 = arith.constant 0 : index
    %c0_106 = arith.constant 0 : index
    %264 = vector.load %arg15[%c0_105, %c0_106] : memref<64x32xf32, #tpu.memory_space<vmem>>, vector<64x32xf32>
    %c0_107 = arith.constant 0 : index
    %c0_108 = arith.constant 0 : index
    %265 = vector.load %arg9[%c0_107, %c0_108] : memref<32x32xf32, #tpu.memory_space<vmem>>, vector<32x32xf32>
    %cst_109 = arith.constant dense<0.000000e+00> : vector<64x32xf32>
    %266 = tpu.matmul %264, %265, %cst_109 {dimension_numbers = #tpu.dot_dimension_numbers<[1], [0], [0], [1], [0, 0, 1, 1], [], []>} : vector<64x32xf32>, vector<32x32xf32>, vector<64x32xf32> -> vector<64x32xf32>
    %c0_110 = arith.constant 0 : index
    %c0_111 = arith.constant 0 : index
    %267 = vector.load %arg10[%c0_110, %c0_111] : memref<1x32xf32, #tpu.memory_space<vmem>>, vector<1x32xf32>
    %268 = vector.broadcast %267 : vector<1x32xf32> to vector<64x32xf32>
    %269 = arith.addf %266, %268 : vector<64x32xf32>
    %cst_112 = arith.constant 0.000000e+00 : f32
    %270 = vector.broadcast %cst_112 : f32 to vector<64x32xf32>
    %271 = arith.maximumf %269, %270 : vector<64x32xf32>
    %c0_113 = arith.constant 0 : index
    %c0_114 = arith.constant 0 : index
    %272 = vector.load %arg0[%c0_113, %c0_114] : memref<64x9xf32, #tpu.memory_space<vmem>>, vector<64x8xf32>
    %c0_115 = arith.constant 0 : index
    %c0_116 = arith.constant 0 : index
    %273 = vector.load %arg11[%c0_115, %c0_116] : memref<32x8xf32, #tpu.memory_space<vmem>>, vector<32x8xf32>
    %cst_117 = arith.constant dense<0.000000e+00> : vector<64x8xf32>
    %274 = tpu.matmul %271, %273, %cst_117 {dimension_numbers = #tpu.dot_dimension_numbers<[1], [0], [0], [1], [0, 0, 1, 1], [], []>} : vector<64x32xf32>, vector<32x8xf32>, vector<64x8xf32> -> vector<64x8xf32>
    %275 = arith.addf %272, %274 : vector<64x8xf32>
    %c0_118 = arith.constant 0 : index
    %c0_119 = arith.constant 0 : index
    %276 = vector.load %arg12[%c0_118, %c0_119] : memref<1x8xf32, #tpu.memory_space<vmem>>, vector<1x8xf32>
    %277 = vector.broadcast %276 : vector<1x8xf32> to vector<64x8xf32>
    %278 = arith.addf %275, %277 : vector<64x8xf32>
    %c0_120 = arith.constant 0 : index
    %c0_121 = arith.constant 0 : index
    %279 = vector.load %arg13[%c0_120, %c0_121] : memref<64x8xf32, #tpu.memory_space<vmem>>, vector<64x8xf32>
    tpu.vector_store %arg13[%c0_120, %c0_121], %278 {strides = array<i32>} : memref<64x8xf32, #tpu.memory_space<vmem>>, vector<64x8xf32>,
    %c0_122 = arith.constant 0 : index
    %c0_123 = arith.constant 0 : index
    %280 = vector.load %arg17[%c0_122, %c0_123] : memref<8x32xf32, #tpu.memory_space<vmem>>, vector<8x32xf32>
    %c0_124 = arith.constant 0 : index
    %c0_125 = arith.constant 0 : index
    %281 = vector.load %arg14[%c0_124, %c0_125] : memref<8x32xf32, #tpu.memory_space<vmem>>, vector<8x32xf32>
    tpu.vector_store %arg14[%c0_124, %c0_125], %280 {strides = array<i32>} : memref<8x32xf32, #tpu.memory_space<vmem>>, vector<8x32xf32>,
    return
  }
}

</mosaic_0001>

<bundles_post_ra>
// kernel: tpu_custom_call.1
= control target key start
LH: loop header
LB: loop body
LE: loop exit
PB: predicated region body
PF: predicated region fallthrough
CT: control target
= control target key end

     0   :  { %vm91_vm0 = vcmask 1046528   ;;  %vm66_vm1 = vcmask 56320   ;;  %vm225_vm2 = vcmask 1040384   ;;  %vm2264_vm3 = vmmov 1   ;;  %s2744_s0 = inlined_call_operand.vmem [shape: f32[64,9], index: 0, kind: input, shape index: {}]   ;;  %s2745_s1 = inlined_call_operand.vmem [shape: f32[64,7], index: 1, kind: input, shape index: {}]   ;;  %s2746_s2 = inlined_call_operand.vmem [shape: f32[9,32], index: 2, kind: input, shape index: {}]   ;;  %s2747_s3 = inlined_call_operand.vmem [shape: f32[7,32], index: 3, kind: input, shape index: {}]   ;;  %s2748_s4 = inlined_call_operand.vmem [shape: f32[1,32], index: 4, kind: input, shape index: {}]   ;;  %s2749_s5 = inlined_call_operand.vmem [shape: f32[32,96], index: 5, kind: input, shape index: {}]   ;;  %s2750_s6 = inlined_call_operand.vmem [shape: f32[1,96], index: 6, kind: input, shape index: {}]   ;;  %s2751_s7 = inlined_call_operand.vmem [shape: f32[32,96], index: 7, kind: input, shape index: {}]   ;;  %s2752_s8 = inlined_call_operand.vmem [shape: f32[1,96], index: 8, kind: input, shape index: {}]   ;;  %s2753_s9 = inlined_call_operand.vmem [shape: f32[32,32], index: 9, kind: input, shape index: {}]   ;;  %s2754_s10 = inlined_call_operand.vmem [shape: f32[1,32], index: 10, kind: input, shape index: {}]   ;;  %s2755_s11 = inlined_call_operand.vmem [shape: f32[32,8], index: 11, kind: input, shape index: {}]   ;;  %s2756_s12 = inlined_call_operand.vmem [shape: f32[1,8], index: 12, kind: input, shape index: {}]   ;;  %s2757_s13 = inlined_call_operand.vmem [shape: f32[64,8], index: 13, kind: output, shape index: {0}]   ;;  %s2758_s14 = inlined_call_operand.hbm [shape: f32[8,32], index: 14, kind: output, shape index: {1}]  }
   0x1   :  { %v65_v0 = vld [vmem:[%s2747_s3] sm:$0x7f]  ;;  %v58_v2 = vld [vmem:[%s2745_s1 + $0x8] sm:$0xff]  ;;  %v59_v5 = vld [vmem:[%s2745_s1 + $0x10] sm:$0xff] }
   0x2   :  { %v57_v1 = vld [vmem:[%s2745_s1] sm:$0xff]  ;;  %1920 = vmatprep.subr.msk.mxu0 %vm91_vm0, %v65_v0  ;;  %v56_v4 = vld [vmem:[%s2746_s2 + $0x8] sm:$0x1]  ;;  %vm2099_vm4 = vmpackc.low %vm225_vm2, %vm2264_vm3 }
   0x3   :  { %1922 = vmatprep.mubr.msk.f32.mxu0 %vm66_vm1, %v57_v1  ;;  %v55_v3 = vld [vmem:[%s2746_s2] sm:$0xff]  ;;  %1921 = vmatpush3.msk.msra.mxu0 %vm91_vm0, %v65_v0  ;;  %v60_v7 = vld [vmem:[%s2745_s1 + $0x18] sm:$0xff]  ;;  %v358_v10 = vld [vmem:[%s2749_s5 + $0x8] sm:$0xff] }
   0x4   :  { %v2098_v6 = vpack.c.bf16 %v56_v4, %v55_v3  ;;  %1923 = vmatmul.mubr.msk.f32.vlgmr.msra.gmra.mrb[0].mxu0 %vm66_vm1, %v58_v2  ;;  %v61_v8 = vld [vmem:[%s2745_s1 + $0x20] sm:$0xff] }
   0x5   :  { %1925 = vmatprep.mubr.msk.f32.mxu0 %vm66_vm1, %v59_v5  ;;  %v357_v9 = vld [vmem:[%s2749_s5] sm:$0xff] }
   0x6   :  { %2100 = vmatprep.subr.msk.bf16.mxu0 %vm2099_vm4, %v2098_v6 }
   0x7   :  { %2103 = vmatpush3.bf16.msk.msra.mxu0 %vm2099_vm4, %v2098_v6 }
   0x8   :  { %1926 = vmatmul.mubr.msk.f32.gmra.mrb[2].mxu0 %vm66_vm1, %v60_v7 }
   0x9   :  { %20 = vsyncpa [#allocation6], 0  ;;  %1928 = vmatprep.mubr.msk.f32.mxu0 %vm66_vm1, %v61_v8  ;;  %v62_v11 = vld [vmem:[%s2745_s1 + $0x28] sm:$0xff]  ;;  %v2104_v12 = vpack.c.bf16 %v358_v10, %v357_v9  ;;  %v63_v13 = vld [vmem:[%s2745_s1 + $0x30] sm:$0xff]  ;;  %vm200_vm5 = vcmask 72704   ;;  %v2265_v26 = vmov 0.0|0.0  }
   0xa   :  { %v64_v14 = vld [vmem:[%s2745_s1 + $0x38] sm:$0xff]  ;;  %v2396_v15 = vld [vmem:[%s2744_s0] sm:$0xff]  ;;  %v2404_v16 = vld [vmem:[%s2744_s0 + $0x8] sm:$0xff]  ;;  %2124 = vmatprep.subr.bf16.mxu0 %v2265_v26  ;;  %vm368_vm6 = vcmask 261120   ;;  %v2266_v30 = vmov 0.0   ;;  %vm2267_vm7 = vmmov 0  }
   0xb   :  { %2105 = vmatprep.subr.bf16.mxu1 %v2104_v12  ;;  %v2409_v17 = vld [vmem:[%s2744_s0 + $0x10] sm:$0xff]  ;;  %v2418_v18 = vld [vmem:[%s2744_s0 + $0x18] sm:$0xff]  ;;  %v2423_v19 = vld [vmem:[%s2744_s0 + $0x20] sm:$0xff]  ;;  %507 = vst.msk [vmem:[#allocation4] sm:$0xff] %vm368_vm6, %v2266_v30  ;;  %vm498_vm8 = vcmask 785408   ;;  %s2268_s28 = smov 64  }
   0xc   :  { %1929 = vmatmul.mubr.msk.f32.gmra.mrb[4].mxu0 %vm66_vm1, %v62_v11  ;;  %2107 = vmatpush3.bf16.msra.mxu1 %v2104_v12  ;;  %v2432_v20 = vld [vmem:[%s2744_s0 + $0x28] sm:$0xff]  ;;  %v2437_v21 = vld [vmem:[%s2744_s0 + $0x30] sm:$0xff]  ;;  %v2446_v22 = vld [vmem:[%s2744_s0 + $0x38] sm:$0xff]  ;;  %s2270_s29 = smov 32   ;;  %vm1733_vm9 = vcmask 64512  }
   0xd   :  { %1931 = vmatprep.mubr.msk.f32.mxu0 %vm66_vm1, %v63_v13  ;;  %v359_v23 = vld [vmem:[%s2749_s5 + $0x10] sm:$0xff]  ;;  %v360_v24 = vld [vmem:[%s2749_s5 + $0x18] sm:$0xff]  ;;  %v508_v27 = vld [vmem:[%s2751_s7] sm:$0xff] }
   0xe   :  { %v2108_v25 = vpack.c.bf16 %v360_v24, %v359_v23  ;;  %v509_v28 = vld [vmem:[%s2751_s7 + $0x8] sm:$0xff]  ;;  %v510_v31 = vld [vmem:[%s2751_s7 + $0x10] sm:$0xff]  ;;  %v511_v32 = vld [vmem:[%s2751_s7 + $0x18] sm:$0xff] }
   0xf   :  { %v2464_v29 = vpack.c.bf16 %v509_v28, %v508_v27  ;;  %v2476_v33 = vpack.c.bf16 %v511_v32, %v510_v31  ;;  %v1780_v34 = vld [vmem:[%s2748_s4] ss:$0 sm:$0xff] }
  0x10   :  { %1932 = vmatmul.mubr.msk.f32.gmra.mrb[6].mxu0 %vm66_vm1, %v64_v14  ;;  %2109 = vmatprep.subr.bf16.mxu1 %v2108_v25  ;;  %v1781_v60 = vld [vmem:[%s2750_s6] ss:$0 sm:$0xff] }
  0x11   :  { %1938 = vmatprep.mubr.msk.f32.mxu0 %vm200_vm5, %v2396_v15  ;;  %2111 = vmatpush3.bf16.msra.mxu1 %v2108_v25  ;;  %v2518_v13 = vld [vmem:[%s2752_s8] ss:$0 sm:$0xff]  ;;  %s2269_s8 = smov 96  }
  0x12   :  { %2112 = vmatprep.subr.bf16.mxu1 %v2265_v26  ;;  %v520_v59 = vld [vmem:[#allocation4] sm:$0xff] }
  0x14   :  { %1939 = vmatmul.mubr.msk.f32.vlgmr.msra.gmra.mrb[0].mxu0 %vm200_vm5, %v2404_v16 }
  0x15   :  { %1941 = vmatprep.mubr.msk.f32.mxu0 %vm200_vm5, %v2409_v17  ;;  %2126 = vmatpush3.bf16.msra.mxu0 %v2464_v29 }
  0x16   :  { %2127 = vmatprep.subr.bf16.mxu0 %v2265_v26 }
  0x18   :  { %1942 = vmatmul.mubr.msk.f32.gmra.mrb[2].mxu0 %vm200_vm5, %v2418_v18 }
  0x19   :  { %1944 = vmatprep.mubr.msk.f32.mxu0 %vm200_vm5, %v2423_v19  ;;  %2129 = vmatpush3.bf16.msra.mxu0 %v2476_v33 }
  0x1a   :  { %2136 = vmatprep.subr.bf16.mxu0 %v2265_v26 }
  0x1c   :  { %1945 = vmatmul.mubr.msk.f32.gmra.mrb[4].mxu0 %vm200_vm5, %v2432_v20 }
  0x1d   :  { %1947 = vmatprep.mubr.msk.f32.mxu0 %vm200_vm5, %v2437_v21 }
  0x20   :  { %1948 = vmatmul.mubr.msk.f32.gmra.mrb[6].mxu0 %vm200_vm5, %v2446_v22 }
  0x21   :  { %2000 = vmatprep.mubr.msk.f32.mxu0 %vm2267_vm7, %v2266_v30 }
  0xe7   :  { %v1940_v35 = vpop.f32.mrb[0].mxu0 }
  0xe8   :  { %v342_v36 = vadd.f32 %v1940_v35, %v1780_v34  ;;  %v295_v37 = vpop.f32.mrb[1].mxu0 }
  0xe9   :  { %v341_v38 = vadd.f32 %v1780_v34, %v295_v37 }
  0xea   :  { %v350_v41 = vmax.f32 %v342_v36, 0.0 }
  0xeb   :  { %v349_v39 = vmax.f32 %v341_v38, 0.0  ;;  %v1943_v40 = vpop.f32.mrb[2].mxu0 }
  0xec   :  { %v344_v42 = vadd.f32 %v1943_v40, %v1780_v34  ;;  %v305_v43 = vpop.f32.mrb[3].mxu0 }
  0xed   :  { %v343_v44 = vadd.f32 %v1780_v34, %v305_v43  ;;  %1958 = vmatprep.mubr.msk.f32.mxu1 %vm368_vm6, %v349_v39 }
  0xee   :  { %1959 = vmatmul.mubr.msk.f32.vlgmr.msra.gmra.mrb[0].mxu1 %vm368_vm6, %v350_v41  ;;  %v352_v47 = vmax.f32 %v344_v42, 0.0 }
  0xef   :  { %v351_v45 = vmax.f32 %v343_v44, 0.0  ;;  %v1946_v46 = vpop.f32.mrb[4].mxu0  ;;  %2114 = vmatpush3.bf16.msra.mxu1 %v2464_v29 }
  0xf0   :  { %v346_v48 = vadd.f32 %v1946_v46, %v1780_v34  ;;  %v315_v49 = vpop.f32.mrb[5].mxu0  ;;  %2115 = vmatprep.subr.bf16.mxu1 %v2265_v26 }
  0xf1   :  { %v345_v50 = vadd.f32 %v1780_v34, %v315_v49  ;;  %1961 = vmatprep.mubr.msk.f32.mxu1 %vm368_vm6, %v351_v45 }
  0xf2   :  { %1962 = vmatmul.mubr.msk.f32.gmra.mrb[2].mxu1 %vm368_vm6, %v352_v47  ;;  %v354_v53 = vmax.f32 %v346_v48, 0.0 }
  0xf3   :  { %v353_v51 = vmax.f32 %v345_v50, 0.0  ;;  %v1949_v52 = vpop.f32.mrb[6].mxu0  ;;  %2117 = vmatpush3.bf16.msra.mxu1 %v2476_v33 }
  0xf4   :  { %v348_v54 = vadd.f32 %v1949_v52, %v1780_v34  ;;  %v325_v55 = vpop.f32.mrb[7].mxu0  ;;  %2118 = vmatprep.subr.bf16.mxu1 %v2265_v26 }
  0xf5   :  { %v347_v56 = vadd.f32 %v1780_v34, %v325_v55  ;;  %1964 = vmatprep.mubr.msk.f32.mxu1 %vm368_vm6, %v353_v51 }
  0xf6   :  { %1965 = vmatmul.mubr.msk.f32.gmra.mrb[4].mxu1 %vm368_vm6, %v354_v53  ;;  %v356_v58 = vmax.f32 %v348_v54, 0.0 }
  0xf7   :  { %v355_v57 = vmax.f32 %v347_v56, 0.0 }
  0xf9   :  { %1967 = vmatprep.mubr.msk.f32.mxu1 %vm368_vm6, %v355_v57 }
  0xfa   :  { %1968 = vmatmul.mubr.msk.f32.gmra.mrb[6].mxu1 %vm368_vm6, %v356_v58 }
  0xfb   :  { %1978 = vmatprep.mubr.msk.f32.mxu1 %vm2267_vm7, %v2266_v30 }
  0xfe   :  { %1979 = vmatmul.mubr.msk.f32.vlgmr.msra.gmra.mrb[8].mxu1 %vm368_vm6, %v520_v59 }
  0xff   :  { %2120 = vmatpush3.bf16.msra.mxu1 %v2464_v29  ;;  %1989 = vmatprep.mubr.msk.f32.mxu1 %vm2267_vm7, %v2266_v30 }
 0x100   :  { %2121 = vmatprep.subr.bf16.mxu1 %v2265_v26 }
 0x103   :  { %2123 = vmatpush3.bf16.msra.mxu1 %v2476_v33 }
 0x104   :  { %2130 = vmatprep.subr.bf16.mxu1 %v2265_v26 }
 0x1c1   :  { %v1960_v61 = vpop.f32.mrb[0].mxu1 }
 0x1c2   :  { %v465_v62 = vadd.f32 %v1960_v61, %v1781_v60  ;;  %v459_v63 = vpop.f32.mrb[1].mxu1 }
 0x1c3   :  { %v460_v0 = vadd.f32 %v1781_v60, %v459_v63 }
 0x1c4   :  { %500 = vst.msk [vmem:[#allocation3 + $0x8] sm:$0xff] %vm498_vm8, %v465_v62 }
 0x1c5   :  { %499 = vst.msk [vmem:[#allocation3] sm:$0xff] %vm498_vm8, %v460_v0  ;;  %v1963_v1 = vpop.f32.mrb[2].mxu1 }
 0x1c6   :  { %v475_v2 = vadd.f32 %v1963_v1, %v1781_v60  ;;  %v469_v3 = vpop.f32.mrb[3].mxu1 }
 0x1c7   :  { %v470_v4 = vadd.f32 %v1781_v60, %v469_v3 }
 0x1c8   :  { %502 = vst.msk [vmem:[#allocation3 + $0x18] sm:$0xff] %vm498_vm8, %v475_v2 }
 0x1c9   :  { %501 = vst.msk [vmem:[#allocation3 + $0x10] sm:$0xff] %vm498_vm8, %v470_v4  ;;  %v1966_v5 = vpop.f32.mrb[4].mxu1 }
 0x1ca   :  { %v485_v6 = vadd.f32 %v1966_v5, %v1781_v60  ;;  %v479_v7 = vpop.f32.mrb[5].mxu1 }
 0x1cb   :  { %v480_v8 = vadd.f32 %v1781_v60, %v479_v7  ;;  %v630_v51 = vld [vmem:[#allocation3 + $0x8] sm:$0xff] }
 0x1cc   :  { %504 = vst.msk [vmem:[#allocation3 + $0x28] sm:$0xff] %vm498_vm8, %v485_v6  ;;  %v519_v25 = vld [vmem:[#allocation3] sm:$0xff] }
 0x1cd   :  { %503 = vst.msk [vmem:[#allocation3 + $0x20] sm:$0xff] %vm498_vm8, %v480_v8  ;;  %v1969_v9 = vpop.f32.mrb[6].mxu1 }
 0x1ce   :  { %v495_v10 = vadd.f32 %v1969_v9, %v1781_v60  ;;  %v489_v11 = vpop.f32.mrb[7].mxu1 }
 0x1cf   :  { %v490_v12 = vadd.f32 %v1781_v60, %v489_v11 }
 0x1d0   :  { %506 = vst.msk [vmem:[#allocation3 + $0x38] sm:$0xff] %vm498_vm8, %v495_v10  ;;  %v742_v9 = vld [vmem:[#allocation3 + $0x10] sm:$0xff] }
 0x1d1   :  { %505 = vst.msk [vmem:[#allocation3 + $0x30] sm:$0xff] %vm498_vm8, %v490_v12  ;;  %v590_v14 = vpop.f32.mrb[8].mxu1 }
 0x1d2   :  { %v591_v23 = vadd.f32 %v2518_v13, %v590_v14  ;;  %v1980_v24 = vpop.f32.mrb[9].mxu1 }
 0x1d4   :  { %602 = vrot.lane.b32.xlu0 %v591_v23, %s2268_s28  ;;  %v594_v27 = vadd.f32 %v591_v23, %v519_v25 }
 0x1d6   :  { %v1792_v28 = vmul.f32 -1.442695, %v594_v27 }
 0x1d8   :  { %2192 = vpow2.f32 %v1792_v28 }
 0x1e2   :  { %v2193_v31 = vpop.eup %2192 }
 0x1e3   :  { %v598_v32 = vadd.f32 1.0, %v2193_v31 }
 0x1e5   :  { %2194 = vrcp.f32 %v598_v32 }
 0x1ef   :  { %v2195_v34 = vpop.eup %2194 }
 0x1f0   :  { %v612_v41 = vsub.f32 1.0, %v2195_v34 }
 0x246   :  { %v603_v35 = vpop.permute.xlu0 %602 }
 0x247   :  { %v605_v36 = vmul.f32 %v2195_v34, %v603_v35 }
 0x249   :  { %607 = vrot.lane.b32.xlu0 %v605_v36, %s2268_s28 }
 0x2bb   :  { %v608_v37 = vpop.permute.xlu0 %607 }
 0x2bc   :  { %v610_v38 = vadd.f32 %v608_v37, %v519_v25 }
 0x2be   :  { %2196 = vtanh.f32 %v610_v38 }
 0x2c8   :  { %v2197_v39 = vpop.eup %2196 }
 0x2c9   :  { %614 = vrot.lane.b32.xlu1 %v2197_v39, %s2269_s8 }
 0x2cd   :  { %618 = vrot.lane.b32.xlu1 %v520_v59, %s2270_s29 }
 0x33b   :  { %v615_v40 = vpop.permute.xlu1 %614 }
 0x33c   :  { %v617_v43 = vmul.f32 %v615_v40, %v612_v41 }
 0x33f   :  { %v619_v42 = vpop.permute.xlu1 %618 }
 0x340   :  { %v621_v44 = vmul.f32 %v2195_v34, %v619_v42 }
 0x342   :  { %v622_v45 = vadd.f32 %v621_v44, %v617_v43  ;;  %v854_v44 = vld [vmem:[#allocation3 + $0x18] sm:$0xff] }
 0x344   :  { %624 = vrot.lane.b32.xlu0 %v622_v45, %s2269_s8 }
 0x3b6   :  { %v625_v46 = vpop.permute.xlu0 %624 }
 0x3b7   :  { %627 = vst.msk [vmem:[#allocation4] sm:$0xff] %vm368_vm6, %v625_v46  ;;  %628 = vst.msk [vmem:[#allocation2] sm:$0xff] %vm368_vm6, %v625_v46 }
 0x3be   :  { %v631_v47 = vld [vmem:[#allocation4] sm:$0xff] }
 0x3bf   :  { %1990 = vmatmul.mubr.msk.f32.vlgmr.msra.gmra.mrb[10].mxu1 %vm368_vm6, %v631_v47 }
 0x3c0   :  { %2132 = vmatpush3.bf16.msra.mxu1 %v2464_v29  ;;  %2011 = vmatprep.mubr.msk.f32.mxu1 %vm2267_vm7, %v2266_v30 }
 0x3c1   :  { %2133 = vmatprep.subr.bf16.mxu1 %v2265_v26 }
 0x3c4   :  { %2135 = vmatpush3.bf16.msra.mxu1 %v2476_v33 }
 0x3c5   :  { %2142 = vmatprep.subr.bf16.mxu1 %v2265_v26 }
 0x492   :  { %v701_v48 = vpop.f32.mrb[10].mxu1 }
 0x493   :  { %v702_v49 = vadd.f32 %v2518_v13, %v701_v48  ;;  %v1991_v50 = vpop.f32.mrb[11].mxu1 }
 0x495   :  { %713 = vrot.lane.b32.xlu1 %v702_v49, %s2268_s28  ;;  %v705_v52 = vadd.f32 %v702_v49, %v630_v51 }
 0x497   :  { %v1794_v53 = vmul.f32 -1.442695, %v705_v52 }
 0x499   :  { %2198 = vpow2.f32 %v1794_v53 }
 0x4a3   :  { %v2199_v54 = vpop.eup %2198 }
 0x4a4   :  { %v709_v55 = vadd.f32 1.0, %v2199_v54 }
 0x4a6   :  { %2200 = vrcp.f32 %v709_v55 }
 0x4b0   :  { %v2201_v56 = vpop.eup %2200 }
 0x4b1   :  { %v723_v63 = vsub.f32 1.0, %v2201_v56 }
 0x507   :  { %v714_v57 = vpop.permute.xlu1 %713 }
 0x508   :  { %v716_v58 = vmul.f32 %v2201_v56, %v714_v57 }
 0x50a   :  { %718 = vrot.lane.b32.xlu0 %v716_v58, %s2268_s28 }
 0x50e   :  { %729 = vrot.lane.b32.xlu0 %v631_v47, %s2270_s29 }
 0x57c   :  { %v719_v59 = vpop.permute.xlu0 %718 }
 0x57d   :  { %v721_v60 = vadd.f32 %v719_v59, %v630_v51 }
 0x57f   :  { %2202 = vtanh.f32 %v721_v60 }
 0x580   :  { %v730_v62 = vpop.permute.xlu0 %729 }
 0x581   :  { %v732_v1 = vmul.f32 %v2201_v56, %v730_v62 }
 0x589   :  { %v2203_v61 = vpop.eup %2202 }
 0x58a   :  { %725 = vrot.lane.b32.xlu1 %v2203_v61, %s2269_s8 }
 0x5fc   :  { %v726_v0 = vpop.permute.xlu1 %725 }
 0x5fd   :  { %v728_v2 = vmul.f32 %v726_v0, %v723_v63 }
 0x5ff   :  { %v733_v3 = vadd.f32 %v732_v1, %v728_v2  ;;  %v966_v2 = vld [vmem:[#allocation3 + $0x20] sm:$0xff] }
 0x601   :  { %735 = vrot.lane.b32.xlu1 %v733_v3, %s2269_s8 }
 0x673   :  { %v736_v4 = vpop.permute.xlu1 %735 }
 0x674   :  { %738 = vst.msk [vmem:[#allocation4] sm:$0xff] %vm368_vm6, %v736_v4  ;;  %740 = vst.msk [vmem:[#allocation2 + $0x8] sm:$0xff] %vm368_vm6, %v736_v4 }
 0x67b   :  { %v743_v5 = vld [vmem:[#allocation4] sm:$0xff] }
 0x67c   :  { %2001 = vmatmul.mubr.msk.f32.vlgmr.msra.gmra.mrb[8].mxu0 %vm368_vm6, %v743_v5 }
 0x67d   :  { %2138 = vmatpush3.bf16.msra.mxu0 %v2464_v29  ;;  %2022 = vmatprep.mubr.msk.f32.mxu0 %vm2267_vm7, %v2266_v30 }
 0x67e   :  { %2139 = vmatprep.subr.bf16.mxu0 %v2265_v26 }
 0x681   :  { %2141 = vmatpush3.bf16.msra.mxu0 %v2476_v33 }
 0x682   :  { %2148 = vmatprep.subr.bf16.mxu0 %v2265_v26 }
 0x74f   :  { %v813_v6 = vpop.f32.mrb[8].mxu0 }
 0x750   :  { %v814_v7 = vadd.f32 %v2518_v13, %v813_v6  ;;  %v2002_v8 = vpop.f32.mrb[9].mxu0 }
 0x752   :  { %825 = vrot.lane.b32.xlu0 %v814_v7, %s2268_s28  ;;  %v817_v10 = vadd.f32 %v814_v7, %v742_v9 }
 0x754   :  { %v1796_v11 = vmul.f32 -1.442695, %v817_v10 }
 0x756   :  { %2204 = vpow2.f32 %v1796_v11 }
 0x760   :  { %v2205_v12 = vpop.eup %2204 }
 0x761   :  { %v821_v14 = vadd.f32 1.0, %v2205_v12 }
 0x763   :  { %2206 = vrcp.f32 %v821_v14 }
 0x76d   :  { %v2207_v23 = vpop.eup %2206 }
 0x76e   :  { %v835_v34 = vsub.f32 1.0, %v2207_v23 }
 0x7c4   :  { %v826_v24 = vpop.permute.xlu0 %825 }
 0x7c5   :  { %v828_v25 = vmul.f32 %v2207_v23, %v826_v24 }
 0x7c7   :  { %830 = vrot.lane.b32.xlu1 %v828_v25, %s2268_s28 }
 0x7cb   :  { %841 = vrot.lane.b32.xlu1 %v743_v5, %s2270_s29 }
 0x839   :  { %v831_v27 = vpop.permute.xlu1 %830 }
 0x83a   :  { %v833_v28 = vadd.f32 %v831_v27, %v742_v9 }
 0x83c   :  { %2208 = vtanh.f32 %v833_v28 }
 0x83d   :  { %v842_v32 = vpop.permute.xlu1 %841 }
 0x83e   :  { %v844_v36 = vmul.f32 %v2207_v23, %v842_v32 }
 0x846   :  { %v2209_v31 = vpop.eup %2208 }
 0x847   :  { %837 = vrot.lane.b32.xlu0 %v2209_v31, %s2269_s8 }
 0x8b9   :  { %v838_v35 = vpop.permute.xlu0 %837 }
 0x8ba   :  { %v840_v37 = vmul.f32 %v838_v35, %v835_v34 }
 0x8bc   :  { %v845_v38 = vadd.f32 %v844_v36, %v840_v37  ;;  %v1078_v37 = vld [vmem:[#allocation3 + $0x28] sm:$0xff] }
 0x8be   :  { %847 = vrot.lane.b32.xlu0 %v845_v38, %s2269_s8 }
 0x930   :  { %v848_v39 = vpop.permute.xlu0 %847 }
 0x931   :  { %850 = vst.msk [vmem:[#allocation4] sm:$0xff] %vm368_vm6, %v848_v39  ;;  %852 = vst.msk [vmem:[#allocation2 + $0x10] sm:$0xff] %vm368_vm6, %v848_v39 }
 0x938   :  { %v855_v40 = vld [vmem:[#allocation4] sm:$0xff] }
 0x939   :  { %2012 = vmatmul.mubr.msk.f32.vlgmr.msra.gmra.mrb[12].mxu1 %vm368_vm6, %v855_v40 }
 0x93a   :  { %2144 = vmatpush3.bf16.msra.mxu1 %v2464_v29  ;;  %2033 = vmatprep.mubr.msk.f32.mxu1 %vm2267_vm7, %v2266_v30 }
 0x93b   :  { %2145 = vmatprep.subr.bf16.mxu1 %v2265_v26 }
 0x93e   :  { %2147 = vmatpush3.bf16.msra.mxu1 %v2476_v33 }
 0x93f   :  { %2154 = vmatprep.subr.bf16.mxu1 %v2265_v26 }
 0xa0c   :  { %v925_v41 = vpop.f32.mrb[12].mxu1 }
 0xa0d   :  { %v926_v42 = vadd.f32 %v2518_v13, %v925_v41  ;;  %v2013_v43 = vpop.f32.mrb[13].mxu1 }
 0xa0f   :  { %937 = vrot.lane.b32.xlu1 %v926_v42, %s2268_s28  ;;  %v929_v45 = vadd.f32 %v926_v42, %v854_v44 }
 0xa11   :  { %v1798_v46 = vmul.f32 -1.442695, %v929_v45  ;;  %v1422_v45 = vld [vmem:[%s2753_s9 + $0x8] sm:$0xff] }
 0xa13   :  { %2210 = vpow2.f32 %v1798_v46 }
 0xa1d   :  { %v2211_v47 = vpop.eup %2210 }
 0xa1e   :  { %v933_v48 = vadd.f32 1.0, %v2211_v47 }
 0xa20   :  { %2212 = vrcp.f32 %v933_v48 }
 0xa2a   :  { %v2213_v49 = vpop.eup %2212 }
 0xa2b   :  { %v947_v56 = vsub.f32 1.0, %v2213_v49 }
 0xa81   :  { %v938_v50 = vpop.permute.xlu1 %937 }
 0xa82   :  { %v940_v51 = vmul.f32 %v2213_v49, %v938_v50 }
 0xa84   :  { %942 = vrot.lane.b32.xlu0 %v940_v51, %s2268_s28 }
 0xa88   :  { %953 = vrot.lane.b32.xlu0 %v855_v40, %s2270_s29 }
 0xaf6   :  { %v943_v52 = vpop.permute.xlu0 %942 }
 0xaf7   :  { %v945_v53 = vadd.f32 %v943_v52, %v854_v44  ;;  %v1421_v44 = vld [vmem:[%s2753_s9] sm:$0xff] }
 0xaf8   :  { %v2160_v46 = vpack.c.bf16 %v1422_v45, %v1421_v44 }
 0xaf9   :  { %2214 = vtanh.f32 %v945_v53 }
 0xafa   :  { %v954_v55 = vpop.permute.xlu0 %953 }
 0xafb   :  { %v956_v58 = vmul.f32 %v2213_v49, %v954_v55  ;;  %v1424_v55 = vld [vmem:[%s2753_s9 + $0x18] sm:$0xff] }
 0xb03   :  { %v2215_v54 = vpop.eup %2214 }
 0xb04   :  { %949 = vrot.lane.b32.xlu1 %v2215_v54, %s2269_s8  ;;  %v1423_v54 = vld [vmem:[%s2753_s9 + $0x10] sm:$0xff] }
 0xb76   :  { %v950_v57 = vpop.permute.xlu1 %949 }
 0xb77   :  { %v952_v59 = vmul.f32 %v950_v57, %v947_v56  ;;  %v2164_v56 = vpack.c.bf16 %v1424_v55, %v1423_v54 }
 0xb79   :  { %v957_v60 = vadd.f32 %v956_v58, %v952_v59  ;;  %v1413_v58 = vld [vmem:[#allocation2] sm:$0xff]  ;;  %v1414_v59 = vld [vmem:[#allocation2 + $0x8] sm:$0xff] }
 0xb7b   :  { %959 = vrot.lane.b32.xlu1 %v957_v60, %s2269_s8  ;;  %v1415_v60 = vld [vmem:[#allocation2 + $0x10] sm:$0xff] }
 0xbed   :  { %v960_v61 = vpop.permute.xlu1 %959 }
 0xbee   :  { %962 = vst.msk [vmem:[#allocation4] sm:$0xff] %vm368_vm6, %v960_v61  ;;  %964 = vst.msk [vmem:[#allocation2 + $0x18] sm:$0xff] %vm368_vm6, %v960_v61 }
 0xbf5   :  { %v967_v62 = vld [vmem:[#allocation4] sm:$0xff]  ;;  %v1416_v61 = vld [vmem:[#allocation2 + $0x18] sm:$0xff] }
 0xbf6   :  { %2023 = vmatmul.mubr.msk.f32.vlgmr.msra.gmra.mrb[10].mxu0 %vm368_vm6, %v967_v62 }
 0xbf7   :  { %2150 = vmatpush3.bf16.msra.mxu0 %v2464_v29  ;;  %2044 = vmatprep.mubr.msk.f32.mxu0 %vm2267_vm7, %v2266_v30 }
 0xbf8   :  { %2151 = vmatprep.subr.bf16.mxu0 %v2265_v26 }
 0xbfb   :  { %2153 = vmatpush3.bf16.msra.mxu0 %v2476_v33 }
 0xbfc   :  { %2161 = vmatprep.subr.bf16.mxu0 %v2160_v46 }
 0xcc9   :  { %v1037_v63 = vpop.f32.mrb[10].mxu0 }
 0xcca   :  { %v1038_v0 = vadd.f32 %v2518_v13, %v1037_v63  ;;  %v2024_v1 = vpop.f32.mrb[11].mxu0 }
 0xccc   :  { %1049 = vrot.lane.b32.xlu0 %v1038_v0, %s2268_s28  ;;  %v1041_v3 = vadd.f32 %v1038_v0, %v966_v2 }
 0xcce   :  { %v1800_v4 = vmul.f32 -1.442695, %v1041_v3 }
 0xcd0   :  { %2216 = vpow2.f32 %v1800_v4 }
 0xcda   :  { %v2217_v5 = vpop.eup %2216 }
 0xcdb   :  { %v1045_v6 = vadd.f32 1.0, %v2217_v5 }
 0xcdd   :  { %2218 = vrcp.f32 %v1045_v6 }
 0xce7   :  { %v2219_v7 = vpop.eup %2218 }
 0xce8   :  { %v1059_v23 = vsub.f32 1.0, %v2219_v7 }
 0xd3e   :  { %v1050_v8 = vpop.permute.xlu0 %1049 }
 0xd3f   :  { %v1052_v9 = vmul.f32 %v2219_v7, %v1050_v8 }
 0xd41   :  { %1054 = vrot.lane.b32.xlu1 %v1052_v9, %s2268_s28  ;;  %v1190_v9 = vld [vmem:[#allocation3 + $0x30] sm:$0xff] }
 0xd45   :  { %1065 = vrot.lane.b32.xlu1 %v967_v62, %s2270_s29 }
 0xdb3   :  { %v1055_v10 = vpop.permute.xlu1 %1054 }
 0xdb4   :  { %v1057_v11 = vadd.f32 %v1055_v10, %v966_v2 }
 0xdb6   :  { %2220 = vtanh.f32 %v1057_v11 }
 0xdb7   :  { %v1066_v14 = vpop.permute.xlu1 %1065 }
 0xdb8   :  { %v1068_v25 = vmul.f32 %v2219_v7, %v1066_v14 }
 0xdc0   :  { %v2221_v12 = vpop.eup %2220 }
 0xdc1   :  { %1061 = vrot.lane.b32.xlu0 %v2221_v12, %s2269_s8 }
 0xe33   :  { %v1062_v24 = vpop.permute.xlu0 %1061 }
 0xe34   :  { %v1064_v27 = vmul.f32 %v1062_v24, %v1059_v23 }
 0xe36   :  { %v1069_v28 = vadd.f32 %v1068_v25, %v1064_v27 }
 0xe38   :  { %1071 = vrot.lane.b32.xlu0 %v1069_v28, %s2269_s8 }
 0xeaa   :  { %v1072_v31 = vpop.permute.xlu0 %1071 }
 0xeab   :  { %1074 = vst.msk [vmem:[#allocation4] sm:$0xff] %vm368_vm6, %v1072_v31  ;;  %1076 = vst.msk [vmem:[#allocation2 + $0x20] sm:$0xff] %vm368_vm6, %v1072_v31 }
 0xeb2   :  { %v1079_v32 = vld [vmem:[#allocation4] sm:$0xff] }
 0xeb3   :  { %2034 = vmatmul.mubr.msk.f32.vlgmr.msra.gmra.mrb[14].mxu1 %vm368_vm6, %v1079_v32  ;;  %v1417_v62 = vld [vmem:[#allocation2 + $0x20] sm:$0xff] }
 0xeb4   :  { %2156 = vmatpush3.bf16.msra.mxu1 %v2464_v29  ;;  %2055 = vmatprep.mubr.msk.f32.mxu1 %vm2267_vm7, %v2266_v30 }
 0xeb5   :  { %2157 = vmatprep.subr.bf16.mxu1 %v2265_v26 }
 0xeb8   :  { %2159 = vmatpush3.bf16.msra.mxu1 %v2476_v33 }
 0xf86   :  { %v1149_v34 = vpop.f32.mrb[14].mxu1 }
 0xf87   :  { %v1150_v35 = vadd.f32 %v2518_v13, %v1149_v34  ;;  %v2035_v36 = vpop.f32.mrb[15].mxu1  ;;  %v1578_v34 = vld [vmem:[%s2755_s11 + $0x8] sm:$0xff] }
 0xf89   :  { %1161 = vrot.lane.b32.xlu1 %v1150_v35, %s2268_s28  ;;  %v1153_v38 = vadd.f32 %v1150_v35, %v1078_v37 }
 0xf8b   :  { %v1802_v39 = vmul.f32 -1.442695, %v1153_v38 }
 0xf8d   :  { %2222 = vpow2.f32 %v1802_v39 }
 0xf97   :  { %v2223_v40 = vpop.eup %2222 }
 0xf98   :  { %v1157_v41 = vadd.f32 1.0, %v2223_v40 }
 0xf9a   :  { %2224 = vrcp.f32 %v1157_v41 }
 0xfa4   :  { %v2225_v29 = vpop.eup %2224 }
 0xfa5   :  { %v1171_v48 = vsub.f32 1.0, %v2225_v29 }
 0xffb   :  { %v1162_v42 = vpop.permute.xlu1 %1161 }
 0xffc   :  { %v1164_v30 = vmul.f32 %v2225_v29, %v1162_v42  ;;  %v2637_v42 = vld [vmem:[%s2754_s10] ss:$0 sm:$0xff] }
 0xffe   :  { %1166 = vrot.lane.b32.xlu0 %v1164_v30, %s2268_s28 }
0x1002   :  { %1177 = vrot.lane.b32.xlu0 %v1079_v32, %s2270_s29  ;;  %v1577_v32 = vld [vmem:[%s2755_s11] sm:$0xff] }
0x1003   :  { %v2168_v35 = vpack.c.bf16 %v1578_v34, %v1577_v32 }
0x1005   :  { %2169 = vmatprep.subr.bf16.mxu1 %v2168_v35 }
0x1070   :  { %v1167_v26 = vpop.permute.xlu0 %1166 }
0x1071   :  { %v1169_v33 = vadd.f32 %v1167_v26, %v1078_v37  ;;  %v1579_v26 = vld [vmem:[%s2755_s11 + $0x10] sm:$0xff] }
0x1073   :  { %2226 = vtanh.f32 %v1169_v33  ;;  %v1580_v33 = vld [vmem:[%s2755_s11 + $0x18] sm:$0xff] }
0x1074   :  { %v1178_v47 = vpop.permute.xlu0 %1177 }
0x1075   :  { %v1180_v50 = vmul.f32 %v2225_v29, %v1178_v47 }
0x107d   :  { %v2227_v43 = vpop.eup %2226 }
0x107e   :  { %1173 = vrot.lane.b32.xlu1 %v2227_v43, %s2269_s8  ;;  %v2172_v43 = vpack.c.bf16 %v1580_v33, %v1579_v26 }
0x10f0   :  { %v1174_v49 = vpop.permute.xlu1 %1173 }
0x10f1   :  { %v1176_v51 = vmul.f32 %v1174_v49, %v1171_v48 }
0x10f3   :  { %v1181_v52 = vadd.f32 %v1180_v50, %v1176_v51 }
0x10f5   :  { %1183 = vrot.lane.b32.xlu1 %v1181_v52, %s2269_s8 }
0x1167   :  { %v1184_v53 = vpop.permute.xlu1 %1183 }
0x1168   :  { %1186 = vst.msk [vmem:[#allocation4] sm:$0xff] %vm368_vm6, %v1184_v53  ;;  %1188 = vst.msk [vmem:[#allocation2 + $0x28] sm:$0xff] %vm368_vm6, %v1184_v53 }
0x116f   :  { %v1191_v57 = vld [vmem:[#allocation4] sm:$0xff]  ;;  %v1418_v63 = vld [vmem:[#allocation2 + $0x28] sm:$0xff] }
0x1170   :  { %2045 = vmatmul.mubr.msk.f32.vlgmr.msra.gmra.mrb[12].mxu0 %vm368_vm6, %v1191_v57 }
0x1171   :  { %2163 = vmatpush3.bf16.msra.mxu0 %v2160_v46  ;;  %2066 = vmatprep.mubr.msk.f32.mxu0 %vm368_vm6, %v1413_v58 }
0x1172   :  { %2165 = vmatprep.subr.bf16.mxu0 %v2164_v56 }
0x1175   :  { %2167 = vmatpush3.bf16.msra.mxu0 %v2164_v56 }
0x1178   :  { %2067 = vmatmul.mubr.msk.f32.vlgmr.msra.gmra.mrb[14].mxu0 %vm368_vm6, %v1414_v59 }
0x1179   :  { %2069 = vmatprep.mubr.msk.f32.mxu0 %vm368_vm6, %v1415_v60 }
0x117c   :  { %2070 = vmatmul.mubr.msk.f32.gmra.mrb[16].mxu0 %vm368_vm6, %v1416_v61  ;;  %v2669_v61 = vld [vmem:[%s2756_s12] ss:$0 sm:$0xff] }
0x117d   :  { %2072 = vmatprep.mubr.msk.f32.mxu0 %vm368_vm6, %v1417_v62 }
0x1180   :  { %2073 = vmatmul.mubr.msk.f32.gmra.mrb[18].mxu0 %vm368_vm6, %v1418_v63 }
0x1243   :  { %v1261_v0 = vpop.f32.mrb[12].mxu0 }
0x1244   :  { %v1262_v1 = vadd.f32 %v2518_v13, %v1261_v0  ;;  %v2046_v2 = vpop.f32.mrb[13].mxu0 }
0x1246   :  { %1273 = vrot.lane.b32.xlu0 %v1262_v1, %s2268_s28  ;;  %v1265_v10 = vadd.f32 %v1262_v1, %v1190_v9 }
0x1248   :  { %v1804_v11 = vmul.f32 -1.442695, %v1265_v10 }
0x124a   :  { %2228 = vpow2.f32 %v1804_v11 }
0x124b   :  { %v2068_v3 = vpop.f32.mrb[14].mxu0 }
0x124c   :  { %v1522_v4 = vpop.f32.mrb[15].mxu0  ;;  %v1528_v47 = vadd.f32 %v2068_v3, %v2637_v42 }
0x124d   :  { %v1523_v30 = vadd.f32 %v2637_v42, %v1522_v4 }
0x124e   :  { %v1562_v49 = vmax.f32 %v1528_v47, 0.0 }
0x124f   :  { %v2071_v5 = vpop.f32.mrb[16].mxu0  ;;  %v1561_v44 = vmax.f32 %v1523_v30, 0.0 }
0x1250   :  { %v1532_v6 = vpop.f32.mrb[17].mxu0  ;;  %v1538_v50 = vadd.f32 %v2071_v5, %v2637_v42 }
0x1251   :  { %v1533_v48 = vadd.f32 %v2637_v42, %v1532_v6 }
0x1252   :  { %v1564_v53 = vmax.f32 %v1538_v50, 0.0 }
0x1253   :  { %v2074_v7 = vpop.f32.mrb[18].mxu0  ;;  %v1563_v51 = vmax.f32 %v1533_v48, 0.0 }
0x1254   :  { %v1542_v8 = vpop.f32.mrb[19].mxu0  ;;  %v2229_v12 = vpop.eup %2228  ;;  %v1548_v54 = vadd.f32 %v2074_v7, %v2637_v42 }
0x1255   :  { %v1269_v14 = vadd.f32 1.0, %v2229_v12  ;;  %v1543_v52 = vadd.f32 %v2637_v42, %v1542_v8 }
0x1256   :  { %v1566_v56 = vmax.f32 %v1548_v54, 0.0 }
0x1257   :  { %2230 = vrcp.f32 %v1269_v14  ;;  %v1565_v55 = vmax.f32 %v1543_v52, 0.0 }
0x1261   :  { %v2231_v23 = vpop.eup %2230 }
0x1262   :  { %v1283_v37 = vsub.f32 1.0, %v2231_v23 }
0x12b8   :  { %v1274_v24 = vpop.permute.xlu0 %1273 }
0x12b9   :  { %v1276_v25 = vmul.f32 %v2231_v23, %v1274_v24 }
0x12bb   :  { %1278 = vrot.lane.b32.xlu1 %v1276_v25, %s2268_s28 }
0x12bf   :  { %1289 = vrot.lane.b32.xlu1 %v1191_v57, %s2270_s29 }
0x132d   :  { %v1279_v27 = vpop.permute.xlu1 %1278 }
0x132e   :  { %v1281_v28 = vadd.f32 %v1279_v27, %v1190_v9 }
0x1330   :  { %2232 = vtanh.f32 %v1281_v28 }
0x1331   :  { %v1290_v36 = vpop.permute.xlu1 %1289 }
0x1332   :  { %v1292_v39 = vmul.f32 %v2231_v23, %v1290_v36 }
0x133a   :  { %v2233_v31 = vpop.eup %2232 }
0x133b   :  { %1285 = vrot.lane.b32.xlu0 %v2233_v31, %s2269_s8 }
0x13ad   :  { %v1286_v38 = vpop.permute.xlu0 %1285 }
0x13ae   :  { %v1288_v40 = vmul.f32 %v1286_v38, %v1283_v37 }
0x13b0   :  { %v1293_v41 = vadd.f32 %v1292_v39, %v1288_v40 }
0x13b2   :  { %1295 = vrot.lane.b32.xlu0 %v1293_v41, %s2269_s8 }
0x1424   :  { %v1296_v29 = vpop.permute.xlu0 %1295 }
0x1425   :  { %1298 = vst.msk [vmem:[#allocation4] sm:$0xff] %vm368_vm6, %v1296_v29  ;;  %1300 = vst.msk [vmem:[#allocation2 + $0x30] sm:$0xff] %vm368_vm6, %v1296_v29 }
0x142c   :  { %v2648_v45 = vld [vmem:[#allocation4] sm:$0xff]  ;;  %v1419_v46 = vld [vmem:[#allocation2 + $0x30] sm:$0xff] }
0x142d   :  { %2056 = vmatmul.mubr.msk.f32.vlgmr.msra.gmra.mrb[16].mxu1 %vm368_vm6, %v2648_v45  ;;  %2075 = vmatprep.mubr.msk.f32.mxu0 %vm368_vm6, %v1419_v46 }
0x142e   :  { %2171 = vmatpush3.bf16.msra.mxu1 %v2168_v35  ;;  %2086 = vmatprep.mubr.msk.f32.mxu1 %vm368_vm6, %v1561_v44 }
0x142f   :  { %2173 = vmatprep.subr.bf16.mxu1 %v2172_v43 }
0x1432   :  { %2175 = vmatpush3.bf16.msra.mxu1 %v2172_v43 }
0x1435   :  { %2087 = vmatmul.mubr.msk.f32.vlgmr.msra.gmra.mrb[18].mxu1 %vm368_vm6, %v1562_v49 }
0x1436   :  { %2089 = vmatprep.mubr.msk.f32.mxu1 %vm368_vm6, %v1563_v51 }
0x1439   :  { %2090 = vmatmul.mubr.msk.f32.gmra.mrb[20].mxu1 %vm368_vm6, %v1564_v53 }
0x143a   :  { %2092 = vmatprep.mubr.msk.f32.mxu1 %vm368_vm6, %v1565_v55 }
0x143d   :  { %2093 = vmatmul.mubr.msk.f32.gmra.mrb[22].mxu1 %vm368_vm6, %v1566_v56 }
0x1500   :  { %v1373_v57 = vpop.f32.mrb[16].mxu1 }
0x1501   :  { %v1374_v58 = vadd.f32 %v2518_v13, %v1373_v57  ;;  %v2057_v59 = vpop.f32.mrb[17].mxu1 }
0x1503   :  { %1385 = vrot.lane.b32.xlu1 %v1374_v58, %s2268_s28 }
0x1508   :  { %v2088_v60 = vpop.f32.mrb[18].mxu1 }
0x1509   :  { %v1711_v62 = vadd.f32 %v2088_v60, %v2404_v16  ;;  %v1671_v63 = vpop.f32.mrb[19].mxu1 }
0x150a   :  { %v1710_v0 = vadd.f32 %v1671_v63, %v2396_v15 }
0x150b   :  { %v1726_v1 = vadd.f32 %v2669_v61, %v1711_v62 }
0x150c   :  { %v1725_v2 = vadd.f32 %v2669_v61, %v1710_v0  ;;  %v2091_v13 = vpop.f32.mrb[20].mxu1 }
0x150d   :  { %1735 = vst.msk [vmem:[%s2757_s13 + $0x8] sm:$0xff] %vm1733_vm9, %v1726_v1  ;;  %v1713_v3 = vadd.f32 %v2091_v13, %v2418_v18  ;;  %v1681_v4 = vpop.f32.mrb[21].mxu1 }
0x150e   :  { %1734 = vst.msk [vmem:[%s2757_s13] sm:$0xff] %vm1733_vm9, %v1725_v2  ;;  %v1712_v15 = vadd.f32 %v1681_v4, %v2409_v17 }
0x150f   :  { %v1728_v16 = vadd.f32 %v2669_v61, %v1713_v3 }
0x1510   :  { %v1727_v5 = vadd.f32 %v2669_v61, %v1712_v15  ;;  %v2094_v6 = vpop.f32.mrb[22].mxu1 }
0x1511   :  { %1737 = vst.msk [vmem:[%s2757_s13 + $0x18] sm:$0xff] %vm1733_vm9, %v1728_v16  ;;  %v1715_v18 = vadd.f32 %v2094_v6, %v2432_v20  ;;  %v1691_v7 = vpop.f32.mrb[23].mxu1  ;;  %v1302_v20 = vld [vmem:[#allocation3 + $0x38] sm:$0xff] }
0x1512   :  { %1736 = vst.msk [vmem:[%s2757_s13 + $0x10] sm:$0xff] %vm1733_vm9, %v1727_v5  ;;  %v1714_v17 = vadd.f32 %v1691_v7, %v2423_v19  ;;  %v1377_v10 = vadd.f32 %v1374_v58, %v1302_v20 }
0x1513   :  { %v1730_v8 = vadd.f32 %v2669_v61, %v1715_v18 }
0x1514   :  { %v1729_v9 = vadd.f32 %v2669_v61, %v1714_v17  ;;  %v1806_v11 = vmul.f32 -1.442695, %v1377_v10 }
0x1515   :  { %1739 = vst.msk [vmem:[%s2757_s13 + $0x28] sm:$0xff] %vm1733_vm9, %v1730_v8 }
0x1516   :  { %1738 = vst.msk [vmem:[%s2757_s13 + $0x20] sm:$0xff] %vm1733_vm9, %v1729_v9  ;;  %2234 = vpow2.f32 %v1806_v11 }
0x1520   :  { %v2235_v12 = vpop.eup %2234 }
0x1521   :  { %v1381_v19 = vadd.f32 1.0, %v2235_v12 }
0x1523   :  { %2236 = vrcp.f32 %v1381_v19 }
0x152d   :  { %v2237_v14 = vpop.eup %2236 }
0x152e   :  { %v1395_v32 = vsub.f32 1.0, %v2237_v14 }
0x1575   :  { %v1386_v23 = vpop.permute.xlu1 %1385 }
0x1576   :  { %v1388_v24 = vmul.f32 %v2237_v14, %v1386_v23 }
0x1578   :  { %1390 = vrot.lane.b32.xlu0 %v1388_v24, %s2268_s28  ;;  %s2271_s28 = smov [#allocation5]  }
0x157c   :  { %1401 = vrot.lane.b32.xlu0 %v2648_v45, %s2270_s29 }
0x15ea   :  { %v1391_v25 = vpop.permute.xlu0 %1390 }
0x15eb   :  { %v1393_v27 = vadd.f32 %v1391_v25, %v1302_v20 }
0x15ed   :  { %2238 = vtanh.f32 %v1393_v27 }
0x15ee   :  { %v1402_v31 = vpop.permute.xlu0 %1401 }
0x15ef   :  { %v1404_v35 = vmul.f32 %v2237_v14, %v1402_v31 }
0x15f7   :  { %v2239_v28 = vpop.eup %2238 }
0x15f8   :  { %1397 = vrot.lane.b32.xlu1 %v2239_v28, %s2269_s8 }
0x166a   :  { %v1398_v34 = vpop.permute.xlu1 %1397 }
0x166b   :  { %v1400_v36 = vmul.f32 %v1398_v34, %v1395_v32 }
0x166d   :  { %v1405_v37 = vadd.f32 %v1404_v35, %v1400_v36 }
0x166f   :  { %1407 = vrot.lane.b32.xlu1 %v1405_v37, %s2269_s8  ;;  %s1752_s8 = sshll.u32 %s2271_s28, 4  ;;  %s1753_s8 = int_to_ptr.vmem [resolvable:$true] %s1752_s8 }
0x1670   :  { %s2240_s29 = scalar_lea.vmem %s1753_s8, 128  ;;  %p2245_p1 = scmp.lt.s32.totalorder %s1753_s8, %s1753_s8 }
0x1671   :  { %p2241_p0 = scmp.ne.s32.totalorder %s1753_s8, %s2240_s29  ;;  %p2246_p2 = scmp.lt.s32.totalorder %s2240_s29, %s2240_s29 }
0x1673   :  { %p2247_p3 = por %p2246_p2, %p2245_p1 }
0x1675   :  { %p2248_p4 = pnand %p2247_p3, %p2241_p0 }
0x16e1   :  { %v1408_v38 = vpop.permute.xlu1 %1407 }
0x16e2   :  { %1410 = vst.msk [vmem:[#allocation4] sm:$0xff] %vm368_vm6, %v1408_v38  ;;  %1412 = vst.msk [vmem:[#allocation2 + $0x38] sm:$0xff] %vm368_vm6, %v1408_v38 }
0x16e9   :  { %v1420_v39 = vld [vmem:[#allocation2 + $0x38] sm:$0xff]  ;;  %v1742_v40 = vld [vmem:[#allocation4] sm:$0xff] }
0x16ea   :  { %2076 = vmatmul.mubr.msk.f32.gmra.mrb[20].mxu0 %vm368_vm6, %v1420_v39  ;;  %1743 = vst.msk [vmem:[#allocation5] sm:$0xff] %vm368_vm6, %v1742_v40 }
0x17bd   :  { %v2077_v41 = vpop.f32.mrb[20].mxu0 }
0x17be   :  { %v1558_v29 = vadd.f32 %v2077_v41, %v2637_v42  ;;  %v1552_v30 = vpop.f32.mrb[21].mxu0 }
0x17bf   :  { %v1553_v26 = vadd.f32 %v2637_v42, %v1552_v30 }
0x17c0   :  { %v1568_v43 = vmax.f32 %v1558_v29, 0.0 }
0x17c1   :  { %v1567_v33 = vmax.f32 %v1553_v26, 0.0 }
0x17c3   :  { %2095 = vmatprep.mubr.msk.f32.mxu1 %vm368_vm6, %v1567_v33 }
0x17c4   :  { %2096 = vmatmul.mubr.msk.f32.gmra.mrb[24].mxu1 %vm368_vm6, %v1568_v43 }
0x17c5   :  { %2251 = shalt.err (!%p2248_p4)
}
0x17c6   :  { %s2252_s9 = scalar_lea.hbm %s2758_s14, 128 }
0x17c7   :  { %p2253_p5 = scmp.ne.s32.totalorder %s2758_s14, %s2252_s9  ;;  %p2256_p6 = scmp.lt.u32.totalorder %s2252_s9, %s2758_s14 }
0x17c9   :  { %p2258_p7 = pnand %p2256_p6, %p2253_p5 }
0x17cb   :  { %2261 = shalt.err (!%p2258_p7)
}
0x17cc   :  { %1755 = dma.vmem_to_hbm [thread:$0]  %s1753_s8, 128, %s2758_s14, [#allocation6]  }
0x1897   :  { %v2097_v42 = vpop.f32.mrb[24].mxu1 }
0x1898   :  { %v1717_v44 = vadd.f32 %v2097_v42, %v2446_v22  ;;  %v1701_v45 = vpop.f32.mrb[25].mxu1 }
0x1899   :  { %v1716_v46 = vadd.f32 %v1701_v45, %v2437_v21 }
0x189a   :  { %v1732_v47 = vadd.f32 %v2669_v61, %v1717_v44 }
0x189b   :  { %v1731_v48 = vadd.f32 %v2669_v61, %v1716_v46 }
0x189c   :  { %1741 = vst.msk [vmem:[%s2757_s13 + $0x38] sm:$0xff] %vm1733_vm9, %v1732_v47 }
0x189d   :  { %1740 = vst.msk [vmem:[%s2757_s13 + $0x30] sm:$0xff] %vm1733_vm9, %v1731_v48 }
0x189e   :  { %2262 = dma.done.wait [#allocation6], 128  }
0x189f   :  { %2263 = vsyncadd [#allocation6], 4294967168 }
0x18a0   :  { %1761 = vsyncpa [#allocation6], 1 }

</bundles_post_ra>
